<compile_context>
chip_gen: v7x
topology: tpu7x:2x2x1
jax: 0.10.0
libtpu: 0.0.40
codegen_flags: <defaults>
</compile_context>

<pallas_src>
import functools
import math

import jax
import jax.numpy as jnp
from jax import lax
from jax.experimental import pallas as pl
from jax.experimental.pallas import tpu as pltpu


_MASK_VALUE = -1e30  # large finite negative: exp underflows to 0, no -inf NaN risk


def _sublane_granule(dtype):
    """Dtype-aware sublane granule: 8 for f32, 16 for bf16, 32 for int8/fp8."""
    return max(8, 32 // jnp.dtype(dtype).itemsize)


def _pick_tile(dim, preferred, granule):
    """Largest tile <= preferred that divides `dim` and is a multiple of `granule`.

    Falls back to the full dimension, which is always a legal TPU block size.
    """
    if dim <= preferred:
        return dim
    t = (preferred // granule) * granule
    while t >= granule:
        if dim % t == 0:
            return t
        t -= granule
    return dim


# ---------------------------------------------------------------------------
# Fused QKV projection: x(B,S,E) @ Wqkv -> qkv laid out as (3, B, H, S, D).
# Grid (3, B, head-groups, S-blocks, K-blocks): each step does a
# (tm, tk) x (tk, group_cols) MXU matmul with group_cols = hg*D >= 256, so the
# MXU N dimension is wide and x is re-read only 3 * num_groups times.
# ---------------------------------------------------------------------------
def _qkv_proj_kernel(x_ref, w_ref, b_ref, o_ref, acc_ref, *,
                     heads_per_group, head_dim):
    ki = pl.program_id(4)  # reduction over d_model (K) is the last grid axis

    @pl.when(ki == 0)
    def _():
        acc_ref[...] = jnp.zeros_like(acc_ref)

    acc_ref[...] += jnp.dot(x_ref[0], w_ref[0],
                            preferred_element_type=jnp.float32)

    @pl.when(ki == pl.num_programs(4) - 1)
    def _():
        out = (acc_ref[...] + b_ref[0].astype(jnp.float32)).astype(o_ref.dtype)
        # Split the (tm, hg*D) result into per-head (tm, D) planes.  Slices are
        # lane-tile aligned (and therefore free) when head_dim % 128 == 0.
        for h in range(heads_per_group):
            o_ref[0, 0, h] = out[:, h * head_dim:(h + 1) * head_dim]


def fused_qkv_projection(x, w_packed, b_packed, n_heads, *,
                         block_m=None, block_k=None, block_n=None,
                         vmem_limit_bytes=None):
    B, S, E = x.shape
    three, E_in, E_out = w_packed.shape
    assert three == 3 and E_in == E and E_out == E
    assert E % n_heads == 0
    D = E // n_heads
    granule = _sublane_granule(x.dtype)
    tm = _pick_tile(S, block_m or 256, granule)
    tk = _pick_tile(E, block_k or 512, 128)
    gn = _pick_tile(E, block_n or 512, D)     # output-column group, multiple of D
    hg = gn // D                              # heads written per step
    num_groups = E // gn
    grid = (3, B, num_groups, S // tm, E // tk)
    kernel = functools.partial(_qkv_proj_kernel,
                               heads_per_group=hg, head_dim=D)
    return pl.pallas_call(
        kernel,
        out_shape=jax.ShapeDtypeStruct((3, B, n_heads, S, D), x.dtype),
        grid=grid,
        in_specs=[
            pl.BlockSpec((1, tm, tk), lambda t, b, g, si, ki: (b, si, ki)),
            pl.BlockSpec((1, tk, gn), lambda t, b, g, si, ki: (t, ki, g)),
            pl.BlockSpec((1, 1, gn), lambda t, b, g, si, ki: (t, 0, g)),
        ],
        out_specs=pl.BlockSpec((1, 1, hg, tm, D),
                               lambda t, b, g, si, ki: (t, b, g, si, 0)),
        scratch_shapes=[pltpu.VMEM((tm, gn), jnp.float32)],
        compiler_params=pltpu.CompilerParams(
            dimension_semantics=("parallel",) * 4 + ("arbitrary",),
            vmem_limit_bytes=vmem_limit_bytes),
    )(x, w_packed, b_packed)


# ---------------------------------------------------------------------------
# Flash causal attention over a (B, H, q_blocks, kv_blocks) grid.
#  * K/V index_maps are clamped to min(ki, qi): blocks above the diagonal are
#    skipped AND issue no new K/V DMAs (the block index does not change).
#  * Finalize/store at ki == qi; the output block stays resident for ki > qi.
#  * ctx is written in (B, S, E) head-concatenated layout (lane-dense) when
#    head_dim % 128 == 0, so the output projection is a plain GEMM over E.
# ---------------------------------------------------------------------------
def _flash_attn_kernel(q_ref, k_ref, v_ref, o_ref, m_scr, l_scr, acc_scr):
    qi = pl.program_id(2)
    ki = pl.program_id(3)

    @pl.when(ki == 0)
    def _():
        m_scr[...] = jnp.full_like(m_scr, _MASK_VALUE)
        l_scr[...] = jnp.zeros_like(l_scr)
        acc_scr[...] = jnp.zeros_like(acc_scr)

    def accumulate(apply_mask):
        q = q_ref[0, 0, 0]                   # 1/sqrt(D) already folded into Wq
        k = k_ref[0, 0, 0]
        v = v_ref[0, 0, 0]
        # q @ k^T without materializing a transposed copy of k.
        s = lax.dot_general(q, k, (((1,), (1,)), ((), ())),
                            preferred_element_type=jnp.float32)
        if apply_mask:                       # only the diagonal block needs masking
            tq, tkv = s.shape
            row = lax.broadcasted_iota(jnp.int32, (tq, tkv), 0)
            col = lax.broadcasted_iota(jnp.int32, (tq, tkv), 1)
            s = jnp.where(col <= row, s, _MASK_VALUE)
        m_prev = m_scr[...]
        m_new = jnp.maximum(m_prev, jnp.max(s, axis=-1, keepdims=True))
        alpha = jnp.exp(m_prev - m_new)
        p = jnp.exp(s - m_new)
        l_scr[...] = alpha * l_scr[...] + jnp.sum(p, axis=-1, keepdims=True)
        acc_scr[...] = alpha * acc_scr[...] + lax.dot_general(
            p.astype(v.dtype), v, (((1,), (0,)), ((), ())),
            preferred_element_type=jnp.float32)
        m_scr[...] = m_new

    @pl.when(ki < qi)          # strictly below diagonal: fully visible, no mask
    def _():
        accumulate(apply_mask=False)

    @pl.when(ki == qi)         # diagonal block: apply causal mask
    def _():
        accumulate(apply_mask=True)

    # Blocks with ki > qi: no compute, no DMA (index_maps clamped), no store.

    @pl.when(ki == qi)         # finalize on the diagonal; output stays resident
    def _():
        # approx=False for exact f32 parity with the reference; switch to
        # approx=True (EUP) for bf16 production outputs.
        inv_l = pl.reciprocal(l_scr[...], approx=False)
        out = (acc_scr[...] * inv_l).astype(o_ref.dtype)
        o_ref[...] = out.reshape(o_ref.shape)


def flash_causal_attention(qkv, *, block_q=None, out_layout_bse=True,
                           vmem_limit_bytes=None):
    three, B, H, S, D = qkv.shape
    assert three == 3
    granule = _sublane_granule(qkv.dtype)
    tile = _pick_tile(S, block_q or 512, granule)   # tq == tkv: diagonal is one block
    nq = S // tile
    itemsize = qkv.dtype.itemsize
    # K/V are streamed ~(nq+1)/2 times each after the causal DMA clamp; Q once.
    kv_passes = (nq + 1) / 2.0
    cost = pl.CostEstimate(
        flops=2 * B * H * S * S * D,                      # ~4*B*H*S^2*D / 2 (causal)
        transcendentals=B * H * S * S // 2,
        bytes_accessed=int(B * H * S * D * itemsize * (1.0 + 2.0 * kv_passes)
                           + B * H * S * D * itemsize),
    )
    if out_layout_bse:
        # Head-concatenated (B, S, E) output: lane-dense stores, and the output
        # projection becomes a plain full-depth GEMM.  Requires D % 128 == 0
        # (or H == 1) for a legal lane-aligned out BlockSpec.
        out_shape = jax.ShapeDtypeStruct((B, S, H * D), qkv.dtype)
        out_spec = pl.BlockSpec((1, tile, D), lambda b, h, qi, ki: (b, qi, h))
    else:
        out_shape = jax.ShapeDtypeStruct((B, H, S, D), qkv.dtype)
        out_spec = pl.BlockSpec((1, 1, tile, D), lambda b, h, qi, ki: (b, h, qi, 0))
    return pl.pallas_call(
        _flash_attn_kernel,
        out_shape=out_shape,
        grid=(B, H, nq, nq),
        in_specs=[
            pl.BlockSpec((1, 1, 1, tile, D),
                         lambda b, h, qi, ki: (0, b, h, qi, 0)),
            # Clamp to the diagonal: no new K/V DMA for skipped causal blocks.
            pl.BlockSpec((1, 1, 1, tile, D),
                         lambda b, h, qi, ki: (1, b, h, jnp.minimum(ki, qi), 0)),
            pl.BlockSpec((1, 1, 1, tile, D),
                         lambda b, h, qi, ki: (2, b, h, jnp.minimum(ki, qi), 0)),
        ],
        out_specs=out_spec,
        scratch_shapes=[
            pltpu.VMEM((tile, 1), jnp.float32),   # running max
            pltpu.VMEM((tile, 1), jnp.float32),   # running sum
            pltpu.VMEM((tile, D), jnp.float32),   # output accumulator
        ],
        compiler_params=pltpu.CompilerParams(
            dimension_semantics=("parallel", "parallel", "parallel", "arbitrary"),
            vmem_limit_bytes=vmem_limit_bytes),
        cost_estimate=cost,
    )(qkv, qkv, qkv)


# ---------------------------------------------------------------------------
# Output projection: plain tiled GEMM ctx(B,S,E) @ Wout(E,E) + bias with full
# contraction depth tk (no reduce-over-heads grid axis, single pass over ctx).
# ---------------------------------------------------------------------------
def _out_proj_kernel(ctx_ref, w_ref, b_ref, o_ref, acc_ref):
    ki = pl.program_id(3)  # reduction over E is the last grid axis

    @pl.when(ki == 0)
    def _():
        acc_ref[...] = jnp.zeros_like(acc_ref)

    acc_ref[...] += jnp.dot(ctx_ref[0], w_ref[...],
                            preferred_element_type=jnp.float32)

    @pl.when(ki == pl.num_programs(3) - 1)
    def _():
        o_ref[0] = (acc_ref[...] + b_ref[...].astype(jnp.float32)).astype(o_ref.dtype)


def fused_out_projection(ctx, w, b2d, *, block_m=None, block_n=None,
                         block_k=None, vmem_limit_bytes=None):
    B, S, E = ctx.shape
    E_in, E_out = w.shape
    assert E_in == E
    granule = _sublane_granule(ctx.dtype)
    tm = _pick_tile(S, block_m or 256, granule)
    tn = _pick_tile(E_out, block_n or 512, 128)
    tk = _pick_tile(E, block_k or 512, 128)
    grid = (B, S // tm, E_out // tn, E // tk)
    return pl.pallas_call(
        _out_proj_kernel,
        out_shape=jax.ShapeDtypeStruct((B, S, E_out), ctx.dtype),
        grid=grid,
        in_specs=[
            pl.BlockSpec((1, tm, tk), lambda b, si, ni, ki: (b, si, ki)),
            pl.BlockSpec((tk, tn), lambda b, si, ni, ki: (ki, ni)),
            pl.BlockSpec((1, tn), lambda b, si, ni, ki: (0, ni)),
        ],
        out_specs=pl.BlockSpec((1, tm, tn), lambda b, si, ni, ki: (b, si, ni)),
        scratch_shapes=[pltpu.VMEM((tm, tn), jnp.float32)],
        compiler_params=pltpu.CompilerParams(
            dimension_semantics=("parallel", "parallel", "parallel", "arbitrary"),
            vmem_limit_bytes=vmem_limit_bytes),
    )(ctx, w, b2d)


# ---------------------------------------------------------------------------
# Module wrapper (mirrors FlashCausalAttention / FlashMHA forward semantics)
# ---------------------------------------------------------------------------
class FlashCausalAttentionPallas:
    """x -> Wqkv -> causal multi-head flash attention -> out_proj.

    attention_dropout is 0 / eval; need_weights=False so attn weights are None.
    On v5e, pass dtype=jnp.bfloat16 to halve HBM streaming traffic (f32 MXU
    accumulation is already in place).  For v7x with enlarged tiles, pass an
    explicit vmem_limit_bytes to the wrappers (64 MiB physical per TensorCore).
    """

    def __init__(self, d_model, n_heads, key, dtype=jnp.float32):
        assert d_model % n_heads == 0
        self.d_model = d_model
        self.n_heads = n_heads
        self.head_dim = d_model // n_heads
        H, D = n_heads, self.head_dim
        k1, k2, k3, k4 = jax.random.split(key, 4)
        lim = 1.0 / math.sqrt(d_model)
        # Standard (in, out) layouts (used by the pure-JAX reference).
        self.wqkv = jax.random.uniform(k1, (d_model, 3 * d_model), dtype, -lim, lim)
        self.bqkv = jax.random.uniform(k2, (3 * d_model,), dtype, -lim, lim)
        self.wout = jax.random.uniform(k3, (d_model, d_model), dtype, -lim, lim)
        self.bout = jax.random.uniform(k4, (d_model,), dtype, -lim, lim)
        # Packed layouts consumed by the kernels, built once at init:
        #  * wqkv_packed: (3, E, E) with output columns ordered (head, dim);
        #    the 1/sqrt(D) attention scale is folded into the Q slice so the
        #    attention kernel does no per-step VPU scaling.
        scale = 1.0 / math.sqrt(D)
        wqkv_t = jnp.transpose(self.wqkv.reshape(d_model, 3, H * D), (1, 0, 2))
        self.wqkv_packed = wqkv_t.at[0].multiply(scale)            # (3, E, E)
        bqkv_t = self.bqkv.reshape(3, 1, H * D)
        self.bqkv_packed = bqkv_t.at[0].multiply(scale)            # (3, 1, E)
        self.wout_packed = self.wout                               # (E, E)
        self.bout_packed = self.bout.reshape(1, d_model)           # (1, E)

    @staticmethod
    def mask_shape(*args, **kwargs):
        return None

    @staticmethod
    def attn_mask_(*args, **kwargs):
        return None

    def __call__(self, x, key_padding_mask=None, attn_mask=None, *,
                 block_m=None, block_k=None, block_n=None, block_attn=None,
                 vmem_limit_bytes=None):
        assert attn_mask is None            # FlashCausalAttention.forward asserts this
        # TODO(synk): key_padding_mask (FlashMHA varlen/unpad path) not implemented.
        assert key_padding_mask is None
        B, S, E = x.shape

        qkv = fused_qkv_projection(
            x, self.wqkv_packed, self.bqkv_packed, self.n_heads,
            block_m=block_m, block_k=block_k, block_n=block_n,
            vmem_limit_bytes=vmem_limit_bytes)                     # (3,B,H,S,D)

        bse = (self.head_dim % 128 == 0) or (self.n_heads == 1)
        ctx = flash_causal_attention(
            qkv, block_q=block_attn, out_layout_bse=bse,
            vmem_limit_bytes=vmem_limit_bytes)                     # (B,S,E) or (B,H,S,D)
        if not bse:
            # TODO(synk): head_dim not a multiple of 128 -> pair heads per output
            # block inside the attention kernel instead of this host transpose.
            ctx = jnp.transpose(ctx, (0, 2, 1, 3)).reshape(B, S, E)

        out = fused_out_projection(
            ctx, self.wout_packed, self.bout_packed,
            block_m=block_m, block_n=block_n, block_k=block_k,
            vmem_limit_bytes=vmem_limit_bytes)                     # (B,S,E)
        return out, None                     # need_weights=False -> attn weights None


# ---------------------------------------------------------------------------
# Pure-JAX reference for correctness checking
# ---------------------------------------------------------------------------
def reference_forward(mod, x):
    B, S, E = x.shape
    H, D = mod.n_heads, mod.head_dim
    qkv = x @ mod.wqkv + mod.bqkv
    qkv = qkv.reshape(B, S, 3, H, D)
    q = jnp.transpose(qkv[:, :, 0], (0, 2, 1, 3))
    k = jnp.transpose(qkv[:, :, 1], (0, 2, 1, 3))
    v = jnp.transpose(qkv[:, :, 2], (0, 2, 1, 3))
    s = jnp.einsum("bhqd,bhkd->bhqk", q, k) / math.sqrt(D)
    causal = jnp.tril(jnp.ones((S, S), bool))
    s = jnp.where(causal[None, None], s, -jnp.inf)
    p = jax.nn.softmax(s, axis=-1)
    ctx = jnp.einsum("bhqk,bhkd->bhqd", p, v)
    ctx = jnp.transpose(ctx, (0, 2, 1, 3)).reshape(B, S, E)
    return ctx @ mod.wout + mod.bout


# ---------------------------------------------------------------------------
if __name__ == "__main__":
    # head_dim = 128 so all output blocks are lane-dense (multiples of 128).
    B, S, D_MODEL, N_HEADS = 2, 256, 256, 2

    key = jax.random.PRNGKey(0)
    kx, kp = jax.random.split(key)
    x = jax.random.normal(kx, (B, S, D_MODEL), jnp.float32)

    module = FlashCausalAttentionPallas(D_MODEL, N_HEADS, kp)

    # Small block overrides so these toy shapes still exercise multi-block grids:
    # online softmax across KV tiles, causal block skipping with the DMA clamp,
    # and the K-reduction accumulators in both projections.  At real sizes use
    # the defaults (block_q=512, tk/tn=512).
    out, attn_weights = module(x, key_padding_mask=None, attn_mask=None,
                               block_m=128, block_k=128, block_n=256,
                               block_attn=128)
    out = jax.block_until_ready(out)

    ref = reference_forward(module, x)
    assert out.shape == (B, S, D_MODEL)
    assert attn_weights is None
    max_err = float(jnp.max(jnp.abs(out - ref)))
    assert jnp.allclose(out, ref, atol=2e-3, rtol=2e-3), \
        f"mismatch vs reference (max abs err {max_err})"

    print("KERNEL_OK")
</pallas_src>

<mosaic_0001>
module attributes {stable_mosaic.version = 11 : i64} {
  func.func @_qkv_proj_kernel(%arg0: i32, %arg1: i32, %arg2: i32, %arg3: i32, %arg4: i32, %arg5: memref<1x128x128xf32, #tpu.memory_space<vmem>>, %arg6: memref<1x128x256xf32, #tpu.memory_space<vmem>>, %arg7: memref<1x1x256xf32, #tpu.memory_space<vmem>>, %arg8: memref<1x1x2x128x128xf32, #tpu.memory_space<vmem>>, %arg9: memref<128x256xf32, #tpu.memory_space<vmem>>) attributes {dimension_semantics = [#tpu.dimension_semantics<parallel>, #tpu.dimension_semantics<parallel>, #tpu.dimension_semantics<parallel>, #tpu.dimension_semantics<parallel>, #tpu.dimension_semantics<arbitrary>], iteration_bounds = array<i64: 3, 2, 1, 2, 2>, scalar_prefetch = 0 : i64, scratch_operands = 1 : i64, tpu.core_type = #tpu.core_type<tc>, window_params = [{transform_indices = @transform_0, window_bounds = array<i64: 1, 128, 128>}, {transform_indices = @transform_1, window_bounds = array<i64: 1, 128, 256>}, {transform_indices = @transform_2, window_bounds = array<i64: 1, 1, 256>}, {transform_indices = @transform_3, window_bounds = array<i64: 1, 1, 2, 128, 128>}]} {
    %c0_i32 = arith.constant 0 : i32
    %0 = arith.cmpi eq, %arg4, %c0_i32 : i32
    %1 = arith.extui %0 : i1 to i32
    %c0_i32_0 = arith.constant 0 : i32
    %2 = arith.cmpi ne, %1, %c0_i32_0 : i32
    scf.if %2 {
      %cst_11 = arith.constant 0.000000e+00 : f32
      %14 = vector.broadcast %cst_11 : f32 to vector<128x256xf32>
      %c0_12 = arith.constant 0 : index
      %c0_13 = arith.constant 0 : index
      %15 = vector.load %arg9[%c0_12, %c0_13] : memref<128x256xf32, #tpu.memory_space<vmem>>, vector<128x256xf32>
      tpu.vector_store %arg9[%c0_12, %c0_13], %14 {strides = array<i32>} : memref<128x256xf32, #tpu.memory_space<vmem>>, vector<128x256xf32>,
    } else {
    }
    %c0 = arith.constant 0 : index
    %c0_1 = arith.constant 0 : index
    %3 = vector.load %arg9[%c0, %c0_1] : memref<128x256xf32, #tpu.memory_space<vmem>>, vector<128x256xf32>
    %c0_2 = arith.constant 0 : index
    %c0_3 = arith.constant 0 : index
    %c0_4 = arith.constant 0 : index
    %4 = vector.load %arg5[%c0_2, %c0_3, %c0_4] : memref<1x128x128xf32, #tpu.memory_space<vmem>>, vector<1x128x128xf32>
    %5 = vector.shape_cast %4 : vector<1x128x128xf32> to vector<128x128xf32>
    %c0_5 = arith.constant 0 : index
    %c0_6 = arith.constant 0 : index
    %c0_7 = arith.constant 0 : index
    %6 = vector.load %arg6[%c0_5, %c0_6, %c0_7] : memref<1x128x256xf32, #tpu.memory_space<vmem>>, vector<1x128x256xf32>
    %7 = vector.shape_cast %6 : vector<1x128x256xf32> to vector<128x256xf32>
    %cst = arith.constant dense<0.000000e+00> : vector<128x256xf32>
    %8 = tpu.matmul %5, %7, %cst {dimension_numbers = #tpu.dot_dimension_numbers<[1], [0], [0], [1], [0, 0, 1, 1], [], []>} : vector<128x128xf32>, vector<128x256xf32>, vector<128x256xf32> -> vector<128x256xf32>
    %9 = arith.addf %3, %8 : vector<128x256xf32>
    %c0_8 = arith.constant 0 : index
    %c0_9 = arith.constant 0 : index
    %10 = vector.load %arg9[%c0_8, %c0_9] : memref<128x256xf32, #tpu.memory_space<vmem>>, vector<128x256xf32>
    tpu.vector_store %arg9[%c0_8, %c0_9], %9 {strides = array<i32>} : memref<128x256xf32, #tpu.memory_space<vmem>>, vector<128x256xf32>,
    %c1_i32 = arith.constant 1 : i32
    %11 = arith.cmpi eq, %arg4, %c1_i32 : i32
    %12 = arith.extui %11 : i1 to i32
    %c0_i32_10 = arith.constant 0 : i32
    %13 = arith.cmpi ne, %12, %c0_i32_10 : i32
    scf.if %13 {
      %c0_11 = arith.constant 0 : index
      %c0_12 = arith.constant 0 : index
      %14 = vector.load %arg9[%c0_11, %c0_12] : memref<128x256xf32, #tpu.memory_space<vmem>>, vector<128x256xf32>
      %c0_13 = arith.constant 0 : index
      %c0_14 = arith.constant 0 : index
      %c0_15 = arith.constant 0 : index
      %15 = vector.load %arg7[%c0_13, %c0_14, %c0_15] : memref<1x1x256xf32, #tpu.memory_space<vmem>>, vector<1x1x256xf32>
      %16 = vector.shape_cast %15 : vector<1x1x256xf32> to vector<1x256xf32>
      %17 = vector.broadcast %16 : vector<1x256xf32> to vector<128x256xf32>
      %18 = arith.addf %14, %17 : vector<128x256xf32>
      %19 = vector.extract_strided_slice %18 {offsets = [0, 0], sizes = [128, 128], strides = [1, 1]} : vector<128x256xf32> to vector<128x128xf32>
      %c0_16 = arith.constant 0 : index
      %c0_17 = arith.constant 0 : index
      %c0_18 = arith.constant 0 : index
      %c0_19 = arith.constant 0 : index
      %c0_20 = arith.constant 0 : index
      %20 = vector.load %arg8[%c0_16, %c0_17, %c0_18, %c0_19, %c0_20] : memref<1x1x2x128x128xf32, #tpu.memory_space<vmem>>, vector<1x1x1x128x128xf32>
      %21 = vector.shape_cast %20 : vector<1x1x1x128x128xf32> to vector<128x128xf32>
      %22 = vector.shape_cast %19 : vector<128x128xf32> to vector<1x1x1x128x128xf32>
      tpu.vector_store %arg8[%c0_16, %c0_17, %c0_18, %c0_19, %c0_20], %22 {strides = array<i32>} : memref<1x1x2x128x128xf32, #tpu.memory_space<vmem>>, vector<1x1x1x128x128xf32>,
      %23 = vector.extract_strided_slice %18 {offsets = [0, 128], sizes = [128, 128], strides = [1, 1]} : vector<128x256xf32> to vector<128x128xf32>
      %c0_21 = arith.constant 0 : index
      %c0_22 = arith.constant 0 : index
      %c1 = arith.constant 1 : index
      %c0_23 = arith.constant 0 : index
      %c0_24 = arith.constant 0 : index
      %24 = vector.load %arg8[%c0_21, %c0_22, %c1, %c0_23, %c0_24] : memref<1x1x2x128x128xf32, #tpu.memory_space<vmem>>, vector<1x1x1x128x128xf32>
      %25 = vector.shape_cast %24 : vector<1x1x1x128x128xf32> to vector<128x128xf32>
      %26 = vector.shape_cast %23 : vector<128x128xf32> to vector<1x1x1x128x128xf32>
      tpu.vector_store %arg8[%c0_21, %c0_22, %c1, %c0_23, %c0_24], %26 {strides = array<i32>} : memref<1x1x2x128x128xf32, #tpu.memory_space<vmem>>, vector<1x1x1x128x128xf32>,
    } else {
    }
    return
  }
  func.func @transform_0(%arg0: i32, %arg1: i32, %arg2: i32, %arg3: i32, %arg4: i32) -> (i32, i32, i32) {
    %c0_i32 = arith.constant 0 : i32
    return %arg1, %arg3, %arg4 : i32, i32, i32
  }
  func.func @transform_1(%arg0: i32, %arg1: i32, %arg2: i32, %arg3: i32, %arg4: i32) -> (i32, i32, i32) {
    %c0_i32 = arith.constant 0 : i32
    return %arg0, %arg4, %arg2 : i32, i32, i32
  }
  func.func @transform_2(%arg0: i32, %arg1: i32, %arg2: i32, %arg3: i32, %arg4: i32) -> (i32, i32, i32) {
    %c0_i32 = arith.constant 0 : i32
    %c0_i32_0 = arith.constant 0 : i32
    return %arg0, %c0_i32, %arg2 : i32, i32, i32
  }
  func.func @transform_3(%arg0: i32, %arg1: i32, %arg2: i32, %arg3: i32, %arg4: i32) -> (i32, i32, i32, i32, i32) {
    %c0_i32 = arith.constant 0 : i32
    %c0_i32_0 = arith.constant 0 : i32
    return %arg0, %arg1, %arg2, %arg3, %c0_i32 : i32, i32, i32, i32, i32
  }
}

</mosaic_0001>

<bundles_post_ra>
// kernel: tpu_custom_call.1
= control target key start
LH: loop header
LB: loop body
LE: loop exit
PB: predicated region body
PF: predicated region fallthrough
CT: control target
= control target key end

     0   :  { %s2224_s0 = inlined_call_operand.hbm [shape: f32[2,256,256], index: 0, kind: input, shape index: {}]   ;;  %s2225_s1 = inlined_call_operand.hbm [shape: f32[3,256,256], index: 1, kind: input, shape index: {}]   ;;  %s2226_s2 = inlined_call_operand.hbm [shape: f32[3,1,256], index: 2, kind: input, shape index: {}]   ;;  %s2227_s3 = inlined_call_operand.hbm [shape: f32[3,2,2,256,128], index: 3, kind: output, shape index: {}]  }
   0x1   :  { %2261 = sst [smem:[#allocation41_spill]] %s2225_s1 }
   0x2   :  { %2262 = sst [smem:[#allocation42_spill]] %s2226_s2 }
   0x3   :  { %2263 = sst [smem:[#allocation43_spill]] %s2227_s3 }
   0x4   :  { %8 = vsyncpa [#allocation4], 0 }
   0x5   :  { %10 = vsyncpa [#allocation4 + $0x1], 0 }
   0x6   :  { %11 = vsyncpa [#allocation7], 0 }
   0x7   :  { %13 = vsyncpa [#allocation7 + $0x1], 0 }
   0x8   :  { %14 = vsyncpa [#allocation5], 0 }
   0x9   :  { %16 = vsyncpa [#allocation5 + $0x1], 0  ;;  %s1614_s12 = smov 0   ;;  %s1616_s13 = smov 0  }
   0xa   :  { %s1618_s14 = smov 0   ;;  %s1620_s15 = smov 0  }
   0xb   :  { %s1622_s16 = smov 0   ;;  %s1624_s17 = smov 0  }
   0xc   :  { %s1626_s18 = smov 0   ;;  %s1628_s19 = smov 0  }
   0xd   :  { %s1630_s20 = smov 0   ;;  %s1632_s21 = smov 0  }
   0xe   :  { %s1634_s22 = smov 0   ;;  %s1636_s23 = smov 0  }
   0xf   :  { %s1638_s24 = smov 0   ;;  %s1640_s25 = smov 0  }
  0x10   :  { %s1642_s26 = smov 0   ;;  %s1644_s27 = smov 0  }
  0x11   :  { %s1646_s28 = smov 0   ;;  %s1648_s29 = smov 0  }
  0x12   :  { %s1650_s30 = smov 0   ;;  %s1652_s4 = smov 0  }
  0x13   :  { %s1654_s5 = smov 0  }
  0x14 LB: > { %2264 = sst [smem:[#allocation16_spill]] %s1496_s12  ;;  %s1718_s6 = sadd.s32 4294967295, %s1576_s5   ;;  %s1576_s5 = sphi %s1654_s5, %s22_s5   ;;  %s1572_s4 = sphi %s1652_s4, %s2358_s4   ;;  %s1568_s30 = sphi %s1650_s30, %s2357_s30   ;;  %s1564_s29 = sphi %s1648_s29, %s2355_s29   ;;  %s1560_s28 = sphi %s1646_s28, %s2353_s28   ;;  %s1556_s27 = sphi %s1644_s27, %s2365_s27   ;;  %s1552_s26 = sphi %s1642_s26, %s2351_s26   ;;  %s1548_s25 = sphi %s1640_s25, %s2350_s25   ;;  %s1544_s24 = sphi %s1638_s24, %s2349_s24   ;;  %s1540_s23 = sphi %s1636_s23, %s2364_s23   ;;  %s1536_s22 = sphi %s1634_s22, %s2363_s22   ;;  %s1532_s21 = sphi %s1632_s21, %s2348_s21   ;;  %s1528_s20 = sphi %s1630_s20, %s2362_s20   ;;  %s1524_s19 = sphi %s1628_s19, %s2361_s19   ;;  %s1520_s18 = sphi %s1626_s18, %s2347_s18   ;;  %s1516_s17 = sphi %s1624_s17, %s2360_s17   ;;  %s1512_s16 = sphi %s1622_s16, %s2359_s16   ;;  %s1508_s15 = sphi %s1620_s15, %s2345_s15   ;;  %s1504_s14 = sphi %s1618_s14, %s2356_s14   ;;  %s1500_s13 = sphi %s1616_s13, %s2354_s13   ;;  %s1496_s12 = sphi %s1614_s12, %s2344_s12  }
  0x15   : > { %2265 = sst [smem:[#allocation17_spill]] %s1500_s13  ;;  %s996_s7 = sadd.s32 4294967294, %s1576_s5  }
  0x16   : > { %2266 = sst [smem:[#allocation18_spill]] %s1508_s15  ;;  %s40_s8 = sadd.s32 1, %s1560_s28 }
  0x17   : > { %2267 = sst [smem:[#allocation19_spill]] %s1512_s16  ;;  %p1723_p0 = scmp.ge.s32.totalorder %s40_s8, 2 }
  0x18   : > { %2268 = sst [smem:[#allocation20_spill]] %s1524_s19  ;;  %p2240_p1 = scmp.eq.s32.totalorder %s1576_s5, 0 }
  0x19   : > { %2269 = sst [smem:[#allocation21_spill]] %s1536_s22  ;;  %p2239_p2 = scmp.eq.s32.totalorder %s1718_s6, 0 }
  0x1a   : > { %2270 = sst [smem:[#allocation22_spill]] %s1544_s24  ;;  %s2367_s8 = smov (%p1723_p0, %s40_s8), 0 }
  0x1b   : > { %2271 = sst [smem:[#allocation23_spill]] %s1548_s25  ;;  %p103_p3 = scmp.ne.s32.totalorder %s1528_s20, %s1524_s19 }
  0x1c   : > { %2272 = sst [smem:[#allocation24_spill]] %s1552_s26  ;;  %p109_p4 = scmp.ne.s32.totalorder %s1524_s19, %s1520_s18 }
  0x1d   : > { %2273 = sst [smem:[#allocation25_spill]] %s1556_s27  ;;  %s1739_s9 = ssub.s32 %s1560_s28, %s2367_s8 }
  0x1e   : > { %2274 = sst [smem:[#allocation26_spill]] %s1560_s28  ;;  %p166_p5 = scmp.ne.s32.totalorder %s1504_s14, %s1500_s13 }
  0x1f   : > { %2275 = sst [smem:[#allocation27_spill]] %s1564_s29  ;;  %p1745_p6 = por %p103_p3, %p2240_p1 }
  0x20   : > { %2276 = sst [smem:[#allocation28_spill]] %s1568_s30  ;;  %p1751_p7 = por %p109_p4, %p2239_p2 }
  0x21   : > { %2277 = sst [smem:[#allocation29_spill]] %s1572_s4  ;;  %p167_p8 = scmp.eq.s32.totalorder %s1718_s6, 23 }
  0x22   : > { %2278 = sst [smem:[#allocation30_spill]] %s1718_s6  ;;  %p172_p9 = scmp.ne.s32.totalorder %s1500_s13, %s1496_s12 }
  0x23   : > { %2280 = sst [smem:[#allocation31_spill]] %s2367_s8  ;;  %p173_p10 = scmp.eq.s32.totalorder %s996_s7, 23 }
  0x24   : > { %s2282_s27 = scalar_select %p1751_p7, 1, 0 }
  0x25   : > { %p1758_p11 = por %p167_p8, %p166_p5  ;;  %p2238_p12 = scmp.lt.s32.totalorder %s1576_s5, 24 }
  0x26   : > { %2283 = sst [smem:[#allocation32_spill]] %s2282_s27  ;;  %p1763_p13 = por %p173_p10, %p172_p9 }
  0x27   : > { %s2284_s18 = scalar_select %p1758_p11, 1, 0 }
  0x28   : > { %s2286_s11 = scalar_select %p1763_p13, 1, 0 }
  0x29   : > { %2285 = sst [smem:[#allocation33_spill]] %s2284_s18  ;;  %s218_s8 = sand.u32 1, %s1576_s5  }
  0x2a   : > { %2287 = sst [smem:[#allocation34_spill]] %s2286_s11  ;;  %s220_s26 = sand.u32 1, %s1528_s20  }
  0x2b   : > { %s1004_s25 = sshll.u32 %s220_s26, 8  ;;  %s1043_s24 = sshll.u32 %s1560_s28, 5 }
  0x2c   : > { %s1007_s27 = sshll.u32 %s1572_s4, 6  ;;  %s222_s19 = scalar_lea.vmem [#allocation6], %s1004_s25 }
  0x2d   : > { %s234_s2 = sshll.u32 %s222_s19, 4  ;;  %s231_s15 = sadd.s32 %s1043_s24, %s1007_s27  ;;  %s1771_s2 = int_to_ptr.vmem [resolvable:$true] %s234_s2 }
  0x2e   : > { %s1008_s7 = sshll.u32 %s231_s15, 7  ;;  %p1777_p3 = pnand %p2238_p12, %p1745_p6 }
  0x2f   : > { %s2289_s1 = sld [smem:[#allocation41_spill]]  ;;  %s1787_s19 = scalar_lea.sflag [#allocation7], %s218_s8 }
  0x30   : > { %2290 = sst [smem:[#allocation35_spill]] %s1787_s19  ;;  %p1306_p6 = pneg %p1777_p3 }
  0x35   : > { %s1784_s26 = scalar_lea.hbm %s2289_s1, %s1008_s7  ;;  %s1309_s24 = scalar_lea.hbm %s2289_s1, 24576 }
  0x36   : > { %s1304_s3 = scalar_lea.hbm %s1784_s26, 4096  ;;  %p1310_p10 = scmp.lt.u32.totalorder %s1784_s26, %s2289_s1 }
  0x37   : > { %p1305_p5 = scmp.ne.s32.totalorder %s1784_s26, %s1304_s3  ;;  %p1311_p12 = scmp.lt.u32.totalorder %s1309_s24, %s1304_s3 }
  0x38   : > { %p1313_p1 = scmp.lt.u32.totalorder %s1304_s3, %s1784_s26 }
  0x39   : > { %p1307_p8 = pnand %p1306_p6, %p1305_p5  ;;  %p1312_p2 = por %p1311_p12, %p1310_p10 }
  0x3b   : > { %p1308_p9 = pneg %p1307_p8  ;;  %p1314_p4 = por %p1313_p1, %p1312_p2 }
  0x3d   : > { %p1315_p13 = pnand %p1314_p4, %p1308_p9 }
  0x3f   : > { %1318 = shalt.err (!%p1315_p13)
}
  0x40   : > { %s1319_s8 = scalar_lea.vmem %s1771_s2, 4096  ;;  %s1578_s18 = smov [#allocation6]  }
  0x41   : > { %p1320_p5 = scmp.ne.s32.totalorder %s1771_s2, %s1319_s8  ;;  %s1324_s7 = sshll.u32 %s1578_s18, 4  ;;  %s1325_s7 = int_to_ptr.vmem [resolvable:$false] %s1324_s7 }
  0x42   : > { %s1326_s13 = scalar_lea.vmem %s1325_s7, 8192  ;;  %p1327_p7 = scmp.lt.s32.totalorder %s1771_s2, %s1325_s7 }
  0x43   : > { %p1322_p8 = pnand %p1320_p5, %p1306_p6  ;;  %p1328_p12 = scmp.lt.s32.totalorder %s1326_s13, %s1319_s8 }
  0x45   : > { %p1323_p11 = pneg %p1322_p8  ;;  %p1329_p10 = por %p1328_p12, %p1327_p7 }
  0x47   : > { %p1330_p1 = pnand %p1329_p10, %p1323_p11 }
  0x49   : > { %1333 = shalt.err (!%p1330_p1)
}
  0x4a   : > { %s2243_s3 = smov 256   ;;  %s1580_s15 = smov 16  }
  0x4b   : > { %1113 = dma.hbm_to_vmem [thread:$0]  (!%p1777_p3), %s1784_s26, 4096, %s1771_s2, %s1787_s19, %s2243_s3, %s2243_s3, %s1580_s15  }
  0x4c   : > { %p263_p2 = scmp.lt.s32.totalorder %s1576_s5, 25  ;;  %p2291_p7 = scmp.ge.s32.totalorder %s1576_s5, 1 }
  0x4d   : > { %s43_s25 = sadd.s32 1, %s1564_s29  ;;  %s51_s27 = sadd.s32 1, %s1568_s30 }
  0x4e   : > { %p1820_p11 = pnand %p2291_p7, %p263_p2  ;;  %s2369_s25 = smov (!%p1723_p0, %s43_s25), %s1564_s29 }
  0x4f   : > { %s66_s8 = sadd.s32 1, %s1540_s23  ;;  %p73_p13 = scmp.ne.s32.totalorder %s1540_s23, %s1536_s22 }
  0x50   : > { %s2292_s24 = scalar_select %p1820_p11, 1, 0 }
  0x51   : > { %p45_p4 = scmp.ge.s32.totalorder %s2369_s25, 2  ;;  %p79_p6 = scmp.ne.s32.totalorder %s1536_s22, %s1532_s21 }
  0x52   : > { %2293 = sst [smem:[#allocation36_spill]] %s2292_s24  ;;  %p2294_p3 = scmp.eq.s32.totalorder %s1576_s5, 0 }
  0x53   : > { %s156_s12 = sadd.s32 1, %s1504_s14  ;;  %s2371_s25 = smov (%p45_p4, %s2369_s25), 0 }
  0x54   : > { %p1836_p9 = por %p2294_p3, %p73_p13  ;;  %2296 = sst [smem:[#allocation37_spill]] %s2371_s25 }
  0x55   : > { %s2373_s27 = smov (!%p45_p4, %s51_s27), %s1568_s30  ;;  %s60_s10 = ssub.s32 %s1564_s29, %s2371_s25 }
  0x56   : > { %p2297_p0 = scmp.eq.s32.totalorder %s1718_s6, 0  ;;  %p53_p8 = scmp.ge.s32.totalorder %s2373_s27, 2 }
  0x57   : > { %s193_s21 = sand.u32 1, %s1540_s23   ;;  %s2301_s7 = sadd.s32 1, %s1572_s4 }
  0x58   : > { %p1848_p5 = por %p2297_p0, %p79_p6  ;;  %s999_s18 = sshll.u32 %s193_s21, 7 }
  0x59   : > { %s2375_s27 = smov (%p53_p8, %s2373_s27), 0  ;;  %s2377_s7 = smov (!%p53_p8, %s2301_s7), %s1572_s4 }
  0x5a   : > { %s2298_s26 = scalar_select %p1848_p5, 1, 0 }
  0x5b   : > { %2300 = sst [smem:[#allocation39_spill]] %s2375_s27  ;;  %s59_s13 = ssub.s32 %s1568_s30, %s2375_s27 }
  0x5c   : > { %2299 = sst [smem:[#allocation38_spill]] %s2298_s26  ;;  %p57_p12 = scmp.ge.s32.totalorder %s2377_s7, 3 }
  0x5d   : > { %s61_s15 = sor.u32 %s60_s10, %s59_s13  ;;  %s1042_s1 = sshll.u32 %s1564_s29, 5 }
  0x5e   : > { %s63_s3 = sor.u32 %s1739_s9, %s61_s15  ;;  %s2379_s7 = smov (%p57_p12, %s2377_s7), 0 }
  0x5f   : > { %2302 = sst [smem:[#allocation40_spill]] %s2379_s7  ;;  %p64_p10 = scmp.eq.s32.totalorder %s63_s3, 0 }
  0x60   : > { %s203_s25 = sadd.s32 %s1560_s28, %s1042_s1  ;;  %s1867_s11 = ssub.s32 %s1572_s4, %s2379_s7 }
  0x61   : > { %s1002_s26 = sshll.u32 %s1568_s30, 6  ;;  %s91_s22 = sor.u32 %s1867_s11, %s1739_s9 }
  0x62   : > { %s1871_s27 = scalar_select %p64_p10, %s1540_s23, %s66_s8  }
  0x63   : > { %s149_s24 = sor.u32 %s1867_s11, %s59_s13  ;;  %p94_p1 = scmp.eq.s32.totalorder %s91_s22, 0 }
  0x64   : > { %s153_s19 = sor.u32 %s149_s24, %s60_s10  ;;  %s205_s15 = sadd.s32 %s1002_s26, %s203_s25 }
  0x65   : > { %p154_p2 = scmp.eq.s32.totalorder %s153_s19, 0  ;;  %s2303_s29 = sadd.s32 1, %s1528_s20 }
  0x66   : > { %s1879_s6 = scalar_select %p94_p1, %s1528_s20, %s2303_s29  }
  0x67   : > { %s1882_s3 = scalar_select %p154_p2, %s1504_s14, %s156_s12  }
  0x68   : > { %s1003_s1 = sshll.u32 %s205_s15, 7  ;;  %s197_s7 = scalar_lea.vmem [#allocation3], %s999_s18 }
  0x69   : > { %s208_s28 = sshll.u32 %s197_s7, 4  ;;  %s1887_s30 = scalar_lea.hbm %s2224_s0, %s1003_s1  ;;  %s1889_s28 = int_to_ptr.vmem [resolvable:$true] %s208_s28 }
  0x6a   : > { %p2304_p7 = scmp.lt.s32.totalorder %s1576_s5, 24  ;;  %s1899_s29 = scalar_lea.sflag [#allocation4], %s193_s21 }
  0x6b   : > { %s1334_s9 = scalar_lea.hbm %s1887_s30, 2048  ;;  %s1339_s19 = scalar_lea.hbm %s2224_s0, 16384 }
  0x6c   : > { %p1895_p13 = pnand %p2304_p7, %p1836_p9  ;;  %p1335_p4 = scmp.ne.s32.totalorder %s1887_s30, %s1334_s9 }
  0x6d   : > { %p1340_p9 = scmp.lt.u32.totalorder %s1887_s30, %s2224_s0  ;;  %p1341_p8 = scmp.lt.u32.totalorder %s1339_s19, %s1334_s9 }
  0x6e   : > { %p1336_p6 = pneg %p1895_p13  ;;  %p1343_p10 = scmp.lt.u32.totalorder %s1334_s9, %s1887_s30 }
  0x6f   : > { %p1342_p12 = por %p1341_p8, %p1340_p9 }
  0x70   : > { %p1337_p3 = pnand %p1336_p6, %p1335_p4 }
  0x71   : > { %p1344_p1 = por %p1343_p10, %p1342_p12 }
  0x72   : > { %p1338_p0 = pneg %p1337_p3 }
  0x74   : > { %p1345_p2 = pnand %p1344_p1, %p1338_p0 }
  0x76   : > { %1348 = shalt.err (!%p1345_p2)
}
  0x77   : > { %s1349_s8 = scalar_lea.vmem %s1889_s28, 2048  ;;  %s1581_s2 = smov [#allocation3]  }
  0x78   : > { %p1350_p7 = scmp.ne.s32.totalorder %s1889_s28, %s1349_s8  ;;  %s1354_s12 = sshll.u32 %s1581_s2, 4  ;;  %s1355_s12 = int_to_ptr.vmem [resolvable:$false] %s1354_s12 }
  0x79   : > { %s1356_s10 = scalar_lea.vmem %s1355_s12, 4096  ;;  %p1357_p5 = scmp.lt.s32.totalorder %s1889_s28, %s1355_s12 }
  0x7a   : > { %p1352_p4 = pnand %p1350_p7, %p1336_p6  ;;  %p1358_p9 = scmp.lt.s32.totalorder %s1356_s10, %s1349_s8 }
  0x7c   : > { %p1353_p3 = pneg %p1352_p4  ;;  %p1359_p8 = por %p1358_p9, %p1357_p5 }
  0x7e   : > { %p1360_p12 = pnand %p1359_p8, %p1353_p3 }
  0x80   : > { %1363 = shalt.err (!%p1360_p12)
}
  0x81   : > { %s1582_s26 = smov 128   ;;  %s2306_s21 = sld [smem:[#allocation19_spill]] }
  0x82   : > { %s2307_s18 = sld [smem:[#allocation18_spill]]  ;;  %s2308_s7 = sld [smem:[#allocation30_spill]] }
  0x83   : > { %s2309_s13 = sld [smem:[#allocation29_spill]]  ;;  %s1583_s15 = smov 8  }
  0x84   : > { %s2310_s1 = smov 256   ;;  %p122_p5 = scmp.eq.s32.totalorder %s1867_s11, 0 }
  0x85   : > { %1110 = dma.hbm_to_vmem [thread:$0]  (!%p1895_p13), %s1887_s30, 2048, %s1889_s28, %s1899_s29, %s2310_s1, %s1582_s26, %s1583_s15  }
  0x86   : > { %s124_s9 = sadd.s32 1, %s1516_s17  ;;  %p2311_p10 = scmp.eq.s32.totalorder %s1576_s5, 0 }
  0x87   : > { %p131_p6 = scmp.ne.s32.totalorder %s1516_s17, %s2306_s21  ;;  %s246_s19 = sand.u32 1, %s1516_s17  }
  0x88   : > { %p137_p0 = scmp.ne.s32.totalorder %s2306_s21, %s2307_s18  ;;  %p2312_p2 = scmp.eq.s32.totalorder %s2308_s7, 0 }
  0x89   : > { %s1935_s16 = scalar_select %p122_p5, %s1516_s17, %s124_s9  }
  0x8a   : > { %p133_p1 = por %p131_p6, %p2311_p10  ;;  %p1941_p7 = por %p137_p0, %p2312_p2 }
  0x8b   : > { %s1044_s24 = sshll.u32 %s2309_s13, 5  ;;  %s1009_s25 = sshll.u32 %s246_s19, 1 }
  0x8c   : > { %s2313_s4 = scalar_select %p1941_p7, 1, 0 }
  0x8d   : > { %s2314_s2 = sld [smem:[#allocation42_spill]]  ;;  %p2315_p13 = scmp.lt.s32.totalorder %s1576_s5, 24 }
  0x8e   : > { %s248_s11 = scalar_lea.vmem [#allocation8], %s1009_s25 }
  0x8f   : > { %p1954_p4 = pnand %p2315_p13, %p133_p1  ;;  %s258_s29 = sshll.u32 %s248_s11, 4  ;;  %s259_s29 = int_to_ptr.vmem [resolvable:$true] %s258_s29 }
  0x91   : > { %p1366_p9 = pneg %p1954_p4 }
  0x93   : > { %s1950_s28 = scalar_lea.hbm %s2314_s2, %s1044_s24  ;;  %s1369_s21 = scalar_lea.hbm %s2314_s2, 96 }
  0x94   : > { %s1364_s12 = scalar_lea.hbm %s1950_s28, 32  ;;  %p1370_p5 = scmp.lt.u32.totalorder %s1950_s28, %s2314_s2 }
  0x95   : > { %p1365_p3 = scmp.ne.s32.totalorder %s1950_s28, %s1364_s12  ;;  %p1371_p6 = scmp.lt.u32.totalorder %s1369_s21, %s1364_s12 }
  0x96   : > { %p1373_p10 = scmp.lt.u32.totalorder %s1364_s12, %s1950_s28 }
  0x97   : > { %p1367_p8 = pnand %p1366_p9, %p1365_p3  ;;  %p1372_p0 = por %p1371_p6, %p1370_p5 }
  0x99   : > { %p1368_p12 = pneg %p1367_p8  ;;  %p1374_p1 = por %p1373_p10, %p1372_p0 }
  0x9b   : > { %p1375_p2 = pnand %p1374_p1, %p1368_p12 }
  0x9d   : > { %1378 = shalt.err (!%p1375_p2)
}
  0x9e   : > { %s1379_s13 = scalar_lea.vmem %s259_s29, 32  ;;  %s1584_s15 = smov [#allocation8]  }
  0x9f   : > { %p1380_p13 = scmp.ne.s32.totalorder %s259_s29, %s1379_s13  ;;  %s1384_s1 = sshll.u32 %s1584_s15, 4  ;;  %s1385_s1 = int_to_ptr.vmem [resolvable:$false] %s1384_s1 }
  0xa0   : > { %s1386_s9 = scalar_lea.vmem %s1385_s1, 64  ;;  %p1387_p7 = scmp.lt.s32.totalorder %s259_s29, %s1385_s1 }
  0xa1   : > { %p1382_p3 = pnand %p1380_p13, %p1366_p9  ;;  %p1388_p11 = scmp.lt.s32.totalorder %s1386_s9, %s1379_s13 }
  0xa3   : > { %p1383_p8 = pneg %p1382_p3  ;;  %p1389_p5 = por %p1388_p11, %p1387_p7 }
  0xa5   : > { %p1390_p6 = pnand %p1389_p5, %p1383_p8 }
  0xa7   : > { %1393 = shalt.err (!%p1390_p6)
}
  0xa8   : > { %s2317_s19 = sld [smem:[#allocation35_spill]]  ;;  %s2318_s24 = sld [smem:[#allocation36_spill]] }
  0xae   : > { %1116 = dma.hbm_to_vmem [thread:$0]  (!%p1954_p4), %s1950_s28, 32, %s259_s29, %s2317_s19  }
  0xaf   : > { %p2319_p12 = scmp.ne.s32.totalorder %s2318_s24, 0 }
  0xb0   : > { %s2320_s25 = sld [smem:[#allocation21_spill]] (!%p2319_p12)  ;;  %s2321_s8 = sld [smem:[#allocation38_spill]] (!%p2319_p12) }
  0xb1   : > { %267 = sbr.rel (%p2319_p12) target bundleno = 540 (0x21c), region = 32 }
  0xb6   : > { %s269_s22 = sand.u32 (!%p2319_p12), 1, %s2320_s25   ;;  %p2322_p9 = scmp.ne.s32.totalorder (!%p2319_p12), %s2321_s8, 0 }
  0xb7   : > { %s1013_s11 = sshll.u32 (!%p2319_p12), %s269_s22, 7  ;;  %s270_s12 = scalar_lea.sflag (!%p2319_p12), [#allocation4], %s269_s22 }
  0xb8   : > { %s1983_s10 = scalar_lea.vmem [#allocation3], %s1013_s11 }
  0xb9   : > { %1479 = dma.done.wait (%p2322_p9), %s270_s12, 2048  }
  0xba   : > { %1481 = vsyncadd (%p2322_p9), %s270_s12, 4294965248  ;;  %s2323_s26 = sld [smem:[#allocation30_spill]]  ;;  %s2325_s21 = sld [smem:[#allocation32_spill]] }
  0xbb   : > { %s2324_s30 = sld [smem:[#allocation20_spill]] }
  0xc0   : > { %s278_s18 = sand.u32 1, %s2323_s26   ;;  %p2326_p11 = scmp.ne.s32.totalorder %s2325_s21, 0 }
  0xc1   : > { %s280_s28 = sand.u32 1, %s2324_s30   ;;  %s279_s7 = scalar_lea.sflag [#allocation7], %s278_s18 }
  0xc2   : > { %s1014_s29 = sshll.u32 %s280_s28, 8 }
  0xc3   : > { %s1991_s13 = scalar_lea.vmem [#allocation6], %s1014_s29 }
  0xc4   : > { %1483 = dma.done.wait (%p2326_p11), %s279_s7, 4096  }
  0xc5   : > { %1485 = vsyncadd (%p2326_p11), %s279_s7, 4294963200  ;;  %s2327_s15 = sld [smem:[#allocation19_spill]]  ;;  %p2328_p7 = scmp.ne.s32.totalorder %s2313_s4, 0 }
  0xcb   : > { %s289_s1 = sand.u32 1, %s2327_s15  }
  0xcc   : > { %s1998_s9 = sshll.u32 %s289_s1, 1 }
  0xcd   : > { %s291_s19 = scalar_lea.vmem [#allocation8], %s1998_s9 }
  0xce   : > { %1487 = dma.done.wait (%p2328_p7), %s279_s7, 32  }
  0xcf   : > { %1489 = vsyncadd (%p2328_p7), %s279_s7, 4294967264  ;;  %s2329_s24 = sld [smem:[#allocation17_spill]]  ;;  %s2330_s11 = sld [smem:[#allocation22_spill]] }
  0xd5   : > { %s321_s25 = sand.u32 1, %s2329_s24   ;;  %p1017_p4 = scmp.ne.s32.totalorder %s2330_s11, 0 }
  0xd6   : > { %s1016_s8 = sshll.u32 %s321_s25, 8  ;;  %v1585_v0 = vmov (!%p1017_p4), 0.0  }
  0xd7   : > { %s2008_s22 = scalar_lea.vmem [#allocation9], %s1016_s8  ;;  %333 = sbr.rel (%p1017_p4) target bundleno = 231 (0xe7), region = 48  ;;  %334 = vst [vmem:[#allocation2] sm:$0xff] (!%p1017_p4), %v1585_v0  ;;  %335 = vst [vmem:[#allocation2 + $0x8] sm:$0xff] (!%p1017_p4), %v1585_v0 }
  0xd8   : > { %336 = vst [vmem:[#allocation2 + $0x10] sm:$0xff] (!%p1017_p4), %v1585_v0  ;;  %337 = vst [vmem:[#allocation2 + $0x18] sm:$0xff] (!%p1017_p4), %v1585_v0 }
  0xd9   : > { %338 = vst [vmem:[#allocation2 + $0x20] sm:$0xff] (!%p1017_p4), %v1585_v0  ;;  %339 = vst [vmem:[#allocation2 + $0x28] sm:$0xff] (!%p1017_p4), %v1585_v0 }
  0xda   : > { %340 = vst [vmem:[#allocation2 + $0x30] sm:$0xff] (!%p1017_p4), %v1585_v0  ;;  %341 = vst [vmem:[#allocation2 + $0x38] sm:$0xff] (!%p1017_p4), %v1585_v0 }
  0xdb   : > { %342 = vst [vmem:[#allocation2 + $0x40] sm:$0xff] (!%p1017_p4), %v1585_v0  ;;  %343 = vst [vmem:[#allocation2 + $0x48] sm:$0xff] (!%p1017_p4), %v1585_v0 }
  0xdc   : > { %344 = vst [vmem:[#allocation2 + $0x50] sm:$0xff] (!%p1017_p4), %v1585_v0  ;;  %345 = vst [vmem:[#allocation2 + $0x58] sm:$0xff] (!%p1017_p4), %v1585_v0 }
  0xdd   : > { %346 = vst [vmem:[#allocation2 + $0x60] sm:$0xff] (!%p1017_p4), %v1585_v0  ;;  %347 = vst [vmem:[#allocation2 + $0x68] sm:$0xff] (!%p1017_p4), %v1585_v0 }
  0xde   : > { %348 = vst [vmem:[#allocation2 + $0x70] sm:$0xff] %v1585_v0  ;;  %349 = vst [vmem:[#allocation2 + $0x78] sm:$0xff] %v1585_v0 }
  0xdf   : > { %350 = vst [vmem:[#allocation2 + $0x80] sm:$0xff] %v1585_v0  ;;  %351 = vst [vmem:[#allocation2 + $0x88] sm:$0xff] %v1585_v0 }
  0xe0   : > { %352 = vst [vmem:[#allocation2 + $0x90] sm:$0xff] %v1585_v0  ;;  %353 = vst [vmem:[#allocation2 + $0x98] sm:$0xff] %v1585_v0 }
  0xe1   : > { %354 = vst [vmem:[#allocation2 + $0xa0] sm:$0xff] %v1585_v0  ;;  %355 = vst [vmem:[#allocation2 + $0xa8] sm:$0xff] %v1585_v0 }
  0xe2   : > { %356 = vst [vmem:[#allocation2 + $0xb0] sm:$0xff] %v1585_v0  ;;  %357 = vst [vmem:[#allocation2 + $0xb8] sm:$0xff] %v1585_v0 }
  0xe3   : > { %358 = vst [vmem:[#allocation2 + $0xc0] sm:$0xff] %v1585_v0  ;;  %359 = vst [vmem:[#allocation2 + $0xc8] sm:$0xff] %v1585_v0 }
  0xe4   : > { %360 = vst [vmem:[#allocation2 + $0xd0] sm:$0xff] %v1585_v0  ;;  %361 = vst [vmem:[#allocation2 + $0xd8] sm:$0xff] %v1585_v0 }
  0xe5   : > { %362 = vst [vmem:[#allocation2 + $0xe0] sm:$0xff] %v1585_v0  ;;  %363 = vst [vmem:[#allocation2 + $0xe8] sm:$0xff] %v1585_v0 }
  0xe6   : > { %364 = vst [vmem:[#allocation2 + $0xf0] sm:$0xff] %v1585_v0  ;;  %365 = vst [vmem:[#allocation2 + $0xf8] sm:$0xff] %v1585_v0 }
  0xe7 PF: > { %v415_v1 = vld [vmem:[%s1991_s13 + $0x8] sm:$0xff]  ;;  %v417_v2 = vld [vmem:[%s1991_s13 + $0x18] sm:$0xff]  ;;  %v414_v3 = vld [vmem:[%s1991_s13] sm:$0xff]  ;;  %v1586_v8 = vmov 0.0   ;;  %s2331_s4 = sld [smem:[#allocation22_spill]] }
  0xe8   : > { %v1045_v4 = vpack.c.bf16 %v417_v2, %v415_v1  ;;  %v416_v5 = vld [vmem:[%s1991_s13 + $0x10] sm:$0xff]  ;;  %v419_v6 = vld [vmem:[%s1991_s13 + $0x28] sm:$0xff]  ;;  %v421_v7 = vld [vmem:[%s1991_s13 + $0x38] sm:$0xff]  ;;  %510 = vmatprep.mubr.f32.mxu0 %v1586_v8  ;;  %558 = vmatprep.mubr.f32.mxu1 %v1586_v8 }
  0xe9   : > { %v1047_v9 = vpack.c.bf16 %v416_v5, %v414_v3  ;;  %v1049_v10 = vpack.c.bf16 %v421_v7, %v419_v6  ;;  %v418_v11 = vld [vmem:[%s1991_s13 + $0x20] sm:$0xff]  ;;  %v420_v12 = vld [vmem:[%s1991_s13 + $0x30] sm:$0xff]  ;;  %v423_v13 = vld [vmem:[%s1991_s13 + $0x48] sm:$0xff] }
  0xea   : > { %1046 = vmatprep.subr.bf16.mxu0 %v1045_v4  ;;  %1077 = vmatprep.subr.bf16.mxu1 %v1045_v4  ;;  %v425_v14 = vld [vmem:[%s1991_s13 + $0x58] sm:$0xff]  ;;  %v1051_v15 = vpack.c.bf16 %v420_v12, %v418_v11  ;;  %v422_v17 = vld [vmem:[%s1991_s13 + $0x40] sm:$0xff]  ;;  %v424_v18 = vld [vmem:[%s1991_s13 + $0x50] sm:$0xff] }
  0xeb   : > { %1048 = vmatpush1.bf16.msra.mxu0 %v1047_v9  ;;  %1085 = vmatpush1.bf16.msra.mxu1 %v1047_v9  ;;  %v1053_v16 = vpack.c.bf16 %v425_v14, %v423_v13  ;;  %v427_v19 = vld [vmem:[%s1991_s13 + $0x68] sm:$0xff]  ;;  %v429_v20 = vld [vmem:[%s1991_s13 + $0x78] sm:$0xff]  ;;  %v1055_v21 = vpack.c.bf16 %v424_v18, %v422_v17  ;;  %v426_v23 = vld [vmem:[%s1991_s13 + $0x60] sm:$0xff] }
  0xec   : > { %1050 = vmatprep.subr.bf16.mxu0 %v1049_v10  ;;  %1078 = vmatprep.subr.bf16.mxu1 %v1049_v10  ;;  %v1057_v22 = vpack.c.bf16 %v429_v20, %v427_v19  ;;  %v428_v24 = vld [vmem:[%s1991_s13 + $0x70] sm:$0xff]  ;;  %v431_v25 = vld [vmem:[%s1991_s13 + $0x88] sm:$0xff]  ;;  %v433_v26 = vld [vmem:[%s1991_s13 + $0x98] sm:$0xff] }
  0xed   : > { %v1059_v27 = vpack.c.bf16 %v428_v24, %v426_v23  ;;  %v1061_v28 = vpack.c.bf16 %v433_v26, %v431_v25  ;;  %v430_v29 = vld [vmem:[%s1991_s13 + $0x80] sm:$0xff]  ;;  %v432_v30 = vld [vmem:[%s1991_s13 + $0x90] sm:$0xff]  ;;  %v435_v31 = vld [vmem:[%s1991_s13 + $0xa8] sm:$0xff]  ;;  %p1018_p0 = scmp.ne.s32.totalorder %s2331_s4, 1 }
  0xee   : > { %v437_v32 = vld [vmem:[%s1991_s13 + $0xb8] sm:$0xff]  ;;  %v1063_v33 = vpack.c.bf16 %v432_v30, %v430_v29  ;;  %v434_v35 = vld [vmem:[%s1991_s13 + $0xa0] sm:$0xff]  ;;  %v436_v36 = vld [vmem:[%s1991_s13 + $0xb0] sm:$0xff] }
  0xef   : > { %1052 = vmatpush1.bf16.msra.mxu0 %v1051_v15  ;;  %1086 = vmatpush1.bf16.msra.mxu1 %v1051_v15  ;;  %v1065_v34 = vpack.c.bf16 %v437_v32, %v435_v31  ;;  %v439_v37 = vld [vmem:[%s1991_s13 + $0xc8] sm:$0xff]  ;;  %v441_v38 = vld [vmem:[%s1991_s13 + $0xd8] sm:$0xff]  ;;  %v1067_v39 = vpack.c.bf16 %v436_v36, %v434_v35  ;;  %v438_v41 = vld [vmem:[%s1991_s13 + $0xc0] sm:$0xff] }
  0xf0   : > { %1054 = vmatprep.subr.bf16.mxu0 %v1053_v16  ;;  %1079 = vmatprep.subr.bf16.mxu1 %v1053_v16  ;;  %v1069_v40 = vpack.c.bf16 %v441_v38, %v439_v37  ;;  %v440_v42 = vld [vmem:[%s1991_s13 + $0xd0] sm:$0xff]  ;;  %v443_v43 = vld [vmem:[%s1991_s13 + $0xe8] sm:$0xff]  ;;  %v445_v44 = vld [vmem:[%s1991_s13 + $0xf8] sm:$0xff] }
  0xf1   : > { %v1071_v45 = vpack.c.bf16 %v440_v42, %v438_v41  ;;  %v1073_v46 = vpack.c.bf16 %v445_v44, %v443_v43  ;;  %v442_v47 = vld [vmem:[%s1991_s13 + $0xe0] sm:$0xff]  ;;  %v444_v48 = vld [vmem:[%s1991_s13 + $0xf0] sm:$0xff]  ;;  %v399_v52 = vld [vmem:[%s1983_s10 + $0x8] sm:$0xff] }
  0xf2   : > { %v1075_v49 = vpack.c.bf16 %v444_v48, %v442_v47  ;;  %v398_v50 = vld [vmem:[%s1983_s10] sm:$0xff]  ;;  %v407_v53 = vld [vmem:[%s1983_s10 + $0x48] sm:$0xff]  ;;  %v400_v54 = vld [vmem:[%s1983_s10 + $0x10] sm:$0xff] }
  0xf3   : > { %1056 = vmatpush1.bf16.msra.mxu0 %v1055_v21  ;;  %1087 = vmatpush1.bf16.msra.mxu1 %v1055_v21  ;;  %v406_v51 = vld [vmem:[%s1983_s10 + $0x40] sm:$0xff]  ;;  %v408_v55 = vld [vmem:[%s1983_s10 + $0x50] sm:$0xff]  ;;  %v401_v56 = vld [vmem:[%s1983_s10 + $0x18] sm:$0xff] }
  0xf4   : > { %1058 = vmatprep.subr.bf16.mxu0 %v1057_v22  ;;  %1080 = vmatprep.subr.bf16.mxu1 %v1057_v22  ;;  %v409_v57 = vld [vmem:[%s1983_s10 + $0x58] sm:$0xff]  ;;  %v402_v58 = vld [vmem:[%s1983_s10 + $0x20] sm:$0xff]  ;;  %v403_v60 = vld [vmem:[%s1983_s10 + $0x28] sm:$0xff] }
  0xf5   : > { %v410_v59 = vld [vmem:[%s1983_s10 + $0x60] sm:$0xff]  ;;  %v411_v61 = vld [vmem:[%s1983_s10 + $0x68] sm:$0xff]  ;;  %v404_v62 = vld [vmem:[%s1983_s10 + $0x30] sm:$0xff] }
  0xf6   : > { %v412_v63 = vld [vmem:[%s1983_s10 + $0x70] sm:$0xff]  ;;  %v405_v0 = vld [vmem:[%s1983_s10 + $0x38] sm:$0xff]  ;;  %v366_v2 = vld [vmem:[#allocation2] sm:$0xff] }
  0xf7   : > { %1060 = vmatpush1.bf16.msra.mxu0 %v1059_v27  ;;  %1088 = vmatpush1.bf16.msra.mxu1 %v1059_v27  ;;  %v413_v1 = vld [vmem:[%s1983_s10 + $0x78] sm:$0xff]  ;;  %v382_v3 = vld [vmem:[#allocation2 + $0x80] sm:$0xff]  ;;  %v367_v4 = vld [vmem:[#allocation2 + $0x8] sm:$0xff] }
  0xf8   : > { %1062 = vmatprep.subr.bf16.mxu0 %v1061_v28  ;;  %1081 = vmatprep.subr.bf16.mxu1 %v1061_v28  ;;  %v383_v5 = vld [vmem:[#allocation2 + $0x88] sm:$0xff]  ;;  %v368_v15 = vld [vmem:[#allocation2 + $0x10] sm:$0xff]  ;;  %v385_v17 = vld [vmem:[#allocation2 + $0x98] sm:$0xff] }
  0xf9   : > { %v384_v16 = vld [vmem:[#allocation2 + $0x90] sm:$0xff]  ;;  %v370_v26 = vld [vmem:[#allocation2 + $0x20] sm:$0xff]  ;;  %v371_v28 = vld [vmem:[#allocation2 + $0x28] sm:$0xff] }
  0xfa   : > { %v386_v27 = vld [vmem:[#allocation2 + $0xa0] sm:$0xff]  ;;  %v387_v29 = vld [vmem:[#allocation2 + $0xa8] sm:$0xff]  ;;  %v372_v38 = vld [vmem:[#allocation2 + $0x30] sm:$0xff] }
  0xfb   : > { %1064 = vmatpush1.bf16.msra.mxu0 %v1063_v33  ;;  %1089 = vmatpush1.bf16.msra.mxu1 %v1063_v33  ;;  %v389_v41 = vld [vmem:[#allocation2 + $0xb8] sm:$0xff] }
  0xfc   : > { %1066 = vmatprep.subr.bf16.mxu0 %v1065_v34  ;;  %1082 = vmatprep.subr.bf16.mxu1 %v1065_v34 }
  0xff   : > { %1068 = vmatpush1.bf16.msra.mxu0 %v1067_v39  ;;  %1090 = vmatpush1.bf16.msra.mxu1 %v1067_v39  ;;  %v388_v39 = vld [vmem:[#allocation2 + $0xb0] sm:$0xff] }
 0x100   : > { %1070 = vmatprep.subr.bf16.mxu0 %v1069_v40  ;;  %1083 = vmatprep.subr.bf16.mxu1 %v1069_v40  ;;  %v373_v40 = vld [vmem:[#allocation2 + $0x38] sm:$0xff] }
 0x103   : > { %1072 = vmatpush1.bf16.msra.mxu0 %v1071_v45  ;;  %1091 = vmatpush1.bf16.msra.mxu1 %v1071_v45 }
 0x104   : > { %1074 = vmatprep.subr.bf16.mxu0 %v1073_v46  ;;  %1084 = vmatprep.subr.bf16.mxu1 %v1073_v46 }
 0x107   : > { %1076 = vmatpush1.bf16.msra.mxu0 %v1075_v49  ;;  %1092 = vmatpush1.bf16.msra.mxu1 %v1075_v49 }
 0x10a   : > { %511 = vmatmul.mubr.f32.vlgmr.msra.gmra.mrb[0].mxu0 %v398_v50  ;;  %559 = vmatmul.mubr.f32.vlgmr.msra.gmra.mrb[0].mxu1 %v406_v51  ;;  %v374_v50 = vld [vmem:[#allocation2 + $0x40] sm:$0xff] }
 0x10b   : > { %516 = vmatprep.mubr.f32.mxu0 %v1586_v8  ;;  %564 = vmatprep.mubr.f32.mxu1 %v1586_v8  ;;  %v390_v51 = vld [vmem:[#allocation2 + $0xc0] sm:$0xff] }
 0x10e   : > { %517 = vmatmul.mubr.f32.gmra.mrb[2].mxu0 %v399_v52  ;;  %565 = vmatmul.mubr.f32.gmra.mrb[2].mxu1 %v407_v53  ;;  %v375_v52 = vld [vmem:[#allocation2 + $0x48] sm:$0xff] }
 0x10f   : > { %522 = vmatprep.mubr.f32.mxu0 %v1586_v8  ;;  %570 = vmatprep.mubr.f32.mxu1 %v1586_v8  ;;  %v391_v53 = vld [vmem:[#allocation2 + $0xc8] sm:$0xff] }
 0x112   : > { %523 = vmatmul.mubr.f32.gmra.mrb[4].mxu0 %v400_v54  ;;  %571 = vmatmul.mubr.f32.gmra.mrb[4].mxu1 %v408_v55 }
 0x113   : > { %528 = vmatprep.mubr.f32.mxu0 %v1586_v8  ;;  %576 = vmatprep.mubr.f32.mxu1 %v1586_v8 }
 0x116   : > { %529 = vmatmul.mubr.f32.gmra.mrb[6].mxu0 %v401_v56  ;;  %577 = vmatmul.mubr.f32.gmra.mrb[6].mxu1 %v409_v57 }
 0x117   : > { %534 = vmatprep.mubr.f32.mxu0 %v1586_v8  ;;  %582 = vmatprep.mubr.f32.mxu1 %v1586_v8 }
 0x11a   : > { %535 = vmatmul.mubr.f32.gmra.mrb[8].mxu0 %v402_v58  ;;  %583 = vmatmul.mubr.f32.gmra.mrb[8].mxu1 %v410_v59 }
 0x11b   : > { %540 = vmatprep.mubr.f32.mxu0 %v1586_v8  ;;  %588 = vmatprep.mubr.f32.mxu1 %v1586_v8 }
 0x11e   : > { %541 = vmatmul.mubr.f32.gmra.mrb[10].mxu0 %v403_v60  ;;  %589 = vmatmul.mubr.f32.gmra.mrb[10].mxu1 %v411_v61 }
 0x11f   : > { %546 = vmatprep.mubr.f32.mxu0 %v1586_v8  ;;  %594 = vmatprep.mubr.f32.mxu1 %v1586_v8 }
 0x122   : > { %547 = vmatmul.mubr.f32.gmra.mrb[12].mxu0 %v404_v62  ;;  %595 = vmatmul.mubr.f32.gmra.mrb[12].mxu1 %v412_v63  ;;  %v376_v62 = vld [vmem:[#allocation2 + $0x50] sm:$0xff] }
 0x123   : > { %552 = vmatprep.mubr.f32.mxu0 %v1586_v8  ;;  %600 = vmatprep.mubr.f32.mxu1 %v1586_v8  ;;  %v369_v8 = vld [vmem:[#allocation2 + $0x18] sm:$0xff]  ;;  %v392_v63 = vld [vmem:[#allocation2 + $0xd0] sm:$0xff] }
 0x126   : > { %553 = vmatmul.mubr.f32.gmra.mrb[14].mxu0 %v405_v0  ;;  %601 = vmatmul.mubr.f32.gmra.mrb[14].mxu1 %v413_v1  ;;  %v377_v0 = vld [vmem:[#allocation2 + $0x58] sm:$0xff] }
 0x127   : > { %v393_v1 = vld [vmem:[#allocation2 + $0xd8] sm:$0xff] }
 0x1dd   : > { %v512_v6 = vpop.f32.mrb[0].mxu0  ;;  %v560_v7 = vpop.f32.mrb[0].mxu1 }
 0x1de   : > { %v607_v9 = vadd.f32 %v512_v6, %v366_v2  ;;  %v623_v10 = vadd.f32 %v560_v7, %v382_v3  ;;  %v514_v11 = vpop.f32.mrb[1].mxu0  ;;  %v562_v12 = vpop.f32.mrb[1].mxu1 }
 0x1df   : > { %v608_v13 = vadd.f32 %v514_v11, %v367_v4  ;;  %v624_v14 = vadd.f32 %v562_v12, %v383_v5  ;;  %v378_v11 = vld [vmem:[#allocation2 + $0x60] sm:$0xff] }
 0x1e0   : > { %639 = vst [vmem:[#allocation2] sm:$0xff] %v607_v9  ;;  %655 = vst [vmem:[#allocation2 + $0x80] sm:$0xff] %v623_v10  ;;  %v394_v12 = vld [vmem:[#allocation2 + $0xe0] sm:$0xff] }
 0x1e1   : > { %640 = vst [vmem:[#allocation2 + $0x8] sm:$0xff] %v608_v13  ;;  %656 = vst [vmem:[#allocation2 + $0x88] sm:$0xff] %v624_v14  ;;  %v518_v18 = vpop.f32.mrb[2].mxu0  ;;  %v566_v19 = vpop.f32.mrb[2].mxu1  ;;  %v379_v13 = vld [vmem:[#allocation2 + $0x68] sm:$0xff] }
 0x1e2   : > { %v609_v20 = vadd.f32 %v518_v18, %v368_v15  ;;  %v625_v21 = vadd.f32 %v566_v19, %v384_v16  ;;  %v520_v22 = vpop.f32.mrb[3].mxu0  ;;  %v568_v23 = vpop.f32.mrb[3].mxu1  ;;  %v395_v14 = vld [vmem:[#allocation2 + $0xe8] sm:$0xff] }
 0x1e3   : > { %v610_v24 = vadd.f32 %v520_v22, %v369_v8  ;;  %v626_v25 = vadd.f32 %v568_v23, %v385_v17  ;;  %v380_v22 = vld [vmem:[#allocation2 + $0x70] sm:$0xff] }
 0x1e4   : > { %641 = vst [vmem:[#allocation2 + $0x10] sm:$0xff] %v609_v20  ;;  %657 = vst [vmem:[#allocation2 + $0x90] sm:$0xff] %v625_v21  ;;  %v396_v23 = vld [vmem:[#allocation2 + $0xf0] sm:$0xff] }
 0x1e5   : > { %642 = vst [vmem:[#allocation2 + $0x18] sm:$0xff] %v610_v24  ;;  %658 = vst [vmem:[#allocation2 + $0x98] sm:$0xff] %v626_v25  ;;  %v524_v30 = vpop.f32.mrb[4].mxu0  ;;  %v572_v31 = vpop.f32.mrb[4].mxu1  ;;  %v381_v24 = vld [vmem:[#allocation2 + $0x78] sm:$0xff] }
 0x1e6   : > { %v611_v32 = vadd.f32 %v524_v30, %v370_v26  ;;  %v627_v33 = vadd.f32 %v572_v31, %v386_v27  ;;  %v526_v34 = vpop.f32.mrb[5].mxu0  ;;  %v574_v35 = vpop.f32.mrb[5].mxu1  ;;  %v397_v25 = vld [vmem:[#allocation2 + $0xf8] sm:$0xff] }
 0x1e7   : > { %v612_v36 = vadd.f32 %v526_v34, %v371_v28  ;;  %v628_v37 = vadd.f32 %v574_v35, %v387_v29  ;;  %v709_v34 = vlaneseq (!%p1018_p0)  ;;  %v707_v35 = vld [vmem:[%s291_s19] sm:$0x3] (!%p1018_p0) }
 0x1e8   : > { %643 = vst [vmem:[#allocation2 + $0x20] sm:$0xff] %v611_v32  ;;  %659 = vst [vmem:[#allocation2 + $0xa0] sm:$0xff] %v627_v33 }
 0x1e9   : > { %644 = vst [vmem:[#allocation2 + $0x28] sm:$0xff] %v612_v36  ;;  %660 = vst [vmem:[#allocation2 + $0xa8] sm:$0xff] %v628_v37  ;;  %v530_v42 = vpop.f32.mrb[6].mxu0  ;;  %v578_v43 = vpop.f32.mrb[6].mxu1  ;;  %v710_v36 = vshrl.u32 (!%p1018_p0), %v709_v34, 7  ;;  %v675_v37 = vld [vmem:[#allocation2] sm:$0xff] (!%p1018_p0) }
 0x1ea   : > { %v613_v44 = vadd.f32 %v530_v42, %v372_v38  ;;  %v629_v45 = vadd.f32 %v578_v43, %v388_v39  ;;  %v532_v46 = vpop.f32.mrb[7].mxu0  ;;  %v580_v47 = vpop.f32.mrb[7].mxu1 }
 0x1eb   : > { %v614_v48 = vadd.f32 %v532_v46, %v373_v40  ;;  %v630_v49 = vadd.f32 %v580_v47, %v389_v41  ;;  %v677_v38 = vld [vmem:[#allocation2 + $0x10] sm:$0xff] (!%p1018_p0)  ;;  %v711_v41 = vsub.s32 (!%p1018_p0), 0, %v710_v36  ;;  %v715_v46 = vsub.s32 (!%p1018_p0), 1, %v710_v36  ;;  %v691_v47 = vld [vmem:[#allocation2 + $0x80] sm:$0xff] (!%p1018_p0) }
 0x1ec   : > { %645 = vst [vmem:[#allocation2 + $0x30] sm:$0xff] %v613_v44  ;;  %661 = vst [vmem:[#allocation2 + $0xb0] sm:$0xff] %v629_v45 }
 0x1ed   : > { %646 = vst [vmem:[#allocation2 + $0x38] sm:$0xff] %v614_v48  ;;  %662 = vst [vmem:[#allocation2 + $0xb8] sm:$0xff] %v630_v49  ;;  %v536_v54 = vpop.f32.mrb[8].mxu0  ;;  %v584_v55 = vpop.f32.mrb[8].mxu1  ;;  %v693_v48 = vld [vmem:[#allocation2 + $0x90] sm:$0xff] (!%p1018_p0) }
 0x1ee   : > { %v615_v56 = vadd.f32 %v536_v54, %v374_v50  ;;  %v631_v57 = vadd.f32 %v584_v55, %v390_v51  ;;  %v538_v58 = vpop.f32.mrb[9].mxu0  ;;  %v586_v59 = vpop.f32.mrb[9].mxu1  ;;  %v712_v50 = vrot.slane (!%p1018_p0), %v707_v35, %v711_v41 }
 0x1ef   : > { %v616_v60 = vadd.f32 %v538_v58, %v375_v52  ;;  %v632_v61 = vadd.f32 %v586_v59, %v391_v53  ;;  %v679_v39 = vld [vmem:[#allocation2 + $0x20] sm:$0xff] (!%p1018_p0) }
 0x1f0   : > { %647 = vst [vmem:[#allocation2 + $0x40] sm:$0xff] %v615_v56  ;;  %663 = vst [vmem:[#allocation2 + $0xc0] sm:$0xff] %v631_v57  ;;  %v695_v49 = vld [vmem:[#allocation2 + $0xa0] sm:$0xff] (!%p1018_p0)  ;;  %v676_v56 = vld [vmem:[#allocation2 + $0x8] sm:$0xff] (!%p1018_p0)  ;;  %v2078_v57 = vrot.slane (!%p1018_p0), %v707_v35, %v715_v46  ;;  %v719_v58 = vadd.f32 (!%p1018_p0), %v712_v50, %v675_v37  ;;  %v721_v59 = vadd.f32 (!%p1018_p0), %v712_v50, %v677_v38 }
 0x1f1   : > { %648 = vst [vmem:[#allocation2 + $0x48] sm:$0xff] %v616_v60  ;;  %664 = vst [vmem:[#allocation2 + $0xc8] sm:$0xff] %v632_v61  ;;  %v542_v2 = vpop.f32.mrb[10].mxu0  ;;  %v590_v3 = vpop.f32.mrb[10].mxu1  ;;  %v723_v60 = vadd.f32 (!%p1018_p0), %v712_v50, %v679_v39 }
 0x1f2   : > { %v617_v4 = vadd.f32 %v542_v2, %v376_v62  ;;  %v633_v5 = vadd.f32 %v590_v3, %v392_v63  ;;  %v544_v6 = vpop.f32.mrb[11].mxu0  ;;  %v592_v7 = vpop.f32.mrb[11].mxu1  ;;  %v678_v62 = vld [vmem:[#allocation2 + $0x18] sm:$0xff] (!%p1018_p0)  ;;  %v680_v63 = vld [vmem:[#allocation2 + $0x28] sm:$0xff] (!%p1018_p0)  ;;  %751 = vst [vmem:[%s2008_s22] sm:$0xff] (!%p1018_p0), %v719_v58  ;;  %752 = vst [vmem:[%s2008_s22 + $0x8] sm:$0xff] (!%p1018_p0), %v721_v59 }
 0x1f3   : > { %v618_v9 = vadd.f32 %v544_v6, %v377_v0  ;;  %v634_v10 = vadd.f32 %v592_v7, %v393_v1  ;;  %v681_v40 = vld [vmem:[#allocation2 + $0x30] sm:$0xff] (!%p1018_p0)  ;;  %753 = vst [vmem:[%s2008_s22 + $0x10] sm:$0xff] (!%p1018_p0), %v723_v60 }
 0x1f4   : > { %649 = vst [vmem:[#allocation2 + $0x50] sm:$0xff] %v617_v4  ;;  %665 = vst [vmem:[#allocation2 + $0xd0] sm:$0xff] %v633_v5  ;;  %v697_v51 = vld [vmem:[#allocation2 + $0xb0] sm:$0xff] (!%p1018_p0)  ;;  %v725_v61 = vadd.f32 (!%p1018_p0), %v712_v50, %v681_v40  ;;  %v682_v0 = vld [vmem:[#allocation2 + $0x38] sm:$0xff] (!%p1018_p0) }
 0x1f5   : > { %650 = vst [vmem:[#allocation2 + $0x58] sm:$0xff] %v618_v9  ;;  %666 = vst [vmem:[#allocation2 + $0xd8] sm:$0xff] %v634_v10  ;;  %v548_v15 = vpop.f32.mrb[12].mxu0  ;;  %v596_v16 = vpop.f32.mrb[12].mxu1  ;;  %v735_v9 = vadd.f32 (!%p1018_p0), %v712_v50, %v691_v47  ;;  %v737_v10 = vadd.f32 (!%p1018_p0), %v712_v50, %v693_v48 }
 0x1f6   : > { %v619_v8 = vadd.f32 %v548_v15, %v378_v11  ;;  %v635_v17 = vadd.f32 %v596_v16, %v394_v12  ;;  %v550_v18 = vpop.f32.mrb[13].mxu0  ;;  %v598_v19 = vpop.f32.mrb[13].mxu1  ;;  %754 = vst [vmem:[%s2008_s22 + $0x18] sm:$0xff] (!%p1018_p0), %v725_v61  ;;  %v739_v11 = vadd.f32 (!%p1018_p0), %v712_v50, %v695_v49  ;;  %v741_v12 = vadd.f32 (!%p1018_p0), %v712_v50, %v697_v51  ;;  %v694_v15 = vld [vmem:[#allocation2 + $0x98] sm:$0xff] (!%p1018_p0) }
 0x1f7   : > { %v620_v20 = vadd.f32 %v550_v18, %v379_v13  ;;  %v636_v21 = vadd.f32 %v598_v19, %v395_v14  ;;  %674 = sbr.rel (%p1018_p0) target bundleno = 522 (0x20a), region = 52  ;;  %v683_v42 = vld [vmem:[#allocation2 + $0x40] sm:$0xff] (!%p1018_p0)  ;;  %v692_v14 = vld [vmem:[#allocation2 + $0x88] sm:$0xff] (!%p1018_p0)  ;;  %759 = vst [vmem:[%s2008_s22 + $0x40] sm:$0xff] (!%p1018_p0), %v735_v9  ;;  %760 = vst [vmem:[%s2008_s22 + $0x48] sm:$0xff] (!%p1018_p0), %v737_v10  ;;  %v738_v34 = vadd.f32 (!%p1018_p0), %v2078_v57, %v694_v15 }
 0x1f8   : > { %651 = vst [vmem:[#allocation2 + $0x60] sm:$0xff] %v619_v8  ;;  %667 = vst [vmem:[#allocation2 + $0xe0] sm:$0xff] %v635_v17  ;;  %v699_v52 = vld [vmem:[#allocation2 + $0xc0] sm:$0xff] (!%p1018_p0)  ;;  %v727_v1 = vadd.f32 (!%p1018_p0), %v712_v50, %v683_v42  ;;  %v684_v5 = vld [vmem:[#allocation2 + $0x48] sm:$0xff] (!%p1018_p0) }
 0x1f9   : > { %652 = vst [vmem:[#allocation2 + $0x68] sm:$0xff] %v620_v20  ;;  %668 = vst [vmem:[#allocation2 + $0xe8] sm:$0xff] %v636_v21  ;;  %v554_v26 = vpop.f32.mrb[14].mxu0  ;;  %v602_v27 = vpop.f32.mrb[14].mxu1  ;;  %v743_v16 = vadd.f32 (!%p1018_p0), %v712_v50, %v699_v52  ;;  %v696_v19 = vld [vmem:[#allocation2 + $0xa8] sm:$0xff] (!%p1018_p0)  ;;  %v698_v20 = vld [vmem:[#allocation2 + $0xb8] sm:$0xff] (!%p1018_p0) }
 0x1fa   : > { %v621_v28 = vadd.f32 %v554_v26, %v380_v22  ;;  %v637_v29 = vadd.f32 %v602_v27, %v396_v23  ;;  %v556_v30 = vpop.f32.mrb[15].mxu0  ;;  %v604_v31 = vpop.f32.mrb[15].mxu1  ;;  %755 = vst [vmem:[%s2008_s22 + $0x20] sm:$0xff] (!%p1018_p0), %v727_v1  ;;  %v700_v21 = vld [vmem:[#allocation2 + $0xc8] sm:$0xff] (!%p1018_p0)  ;;  %761 = vst [vmem:[%s2008_s22 + $0x50] sm:$0xff] (!%p1018_p0), %v739_v11  ;;  %v720_v22 = vadd.f32 (!%p1018_p0), %v2078_v57, %v676_v56 }
 0x1fb   : > { %v622_v32 = vadd.f32 %v556_v30, %v381_v24  ;;  %v638_v33 = vadd.f32 %v604_v31, %v397_v25  ;;  %v685_v43 = vld [vmem:[#allocation2 + $0x50] sm:$0xff] (!%p1018_p0)  ;;  %762 = vst [vmem:[%s2008_s22 + $0x58] sm:$0xff] (!%p1018_p0), %v741_v12  ;;  %v722_v23 = vadd.f32 (!%p1018_p0), %v2078_v57, %v678_v62  ;;  %v724_v24 = vadd.f32 (!%p1018_p0), %v2078_v57, %v680_v63 }
 0x1fc   : > { %653 = vst [vmem:[#allocation2 + $0x70] sm:$0xff] %v621_v28  ;;  %669 = vst [vmem:[#allocation2 + $0xf0] sm:$0xff] %v637_v29  ;;  %v701_v53 = vld [vmem:[#allocation2 + $0xd0] sm:$0xff] (!%p1018_p0)  ;;  %v729_v2 = vadd.f32 (!%p1018_p0), %v712_v50, %v685_v43  ;;  %v686_v6 = vld [vmem:[#allocation2 + $0x58] sm:$0xff] (!%p1018_p0)  ;;  %v726_v25 = vadd.f32 (!%p1018_p0), %v2078_v57, %v682_v0  ;;  %v728_v29 = vadd.f32 (!%p1018_p0), %v2078_v57, %v684_v5 }
 0x1fd   : > { %654 = vst [vmem:[#allocation2 + $0x78] sm:$0xff] %v622_v32  ;;  %670 = vst [vmem:[#allocation2 + $0xf8] sm:$0xff] %v638_v33  ;;  %v745_v8 = vadd.f32 (!%p1018_p0), %v712_v50, %v701_v53  ;;  %v702_v26 = vld [vmem:[#allocation2 + $0xd8] sm:$0xff] (!%p1018_p0)  ;;  %v730_v30 = vadd.f32 (!%p1018_p0), %v2078_v57, %v686_v6  ;;  %v736_v33 = vadd.f32 (!%p1018_p0), %v2078_v57, %v692_v14 }
 0x1fe   : > { %756 = vst [vmem:[%s2008_s22 + $0x28] sm:$0xff] %v729_v2  ;;  %763 = vst [vmem:[%s2008_s22 + $0x60] sm:$0xff] %v743_v16  ;;  %v740_v35 = vadd.f32 %v2078_v57, %v696_v19  ;;  %v742_v36 = vadd.f32 %v2078_v57, %v698_v20  ;;  %v744_v37 = vadd.f32 %v2078_v57, %v700_v21 }
 0x1ff   : > { %v687_v44 = vld [vmem:[#allocation2 + $0x60] sm:$0xff]  ;;  %764 = vst [vmem:[%s2008_s22 + $0x68] sm:$0xff] %v745_v8  ;;  %1019 = vst [vmem:[%s2008_s22 + $0x80] sm:$0xff] %v720_v22  ;;  %v746_v38 = vadd.f32 %v2078_v57, %v702_v26 }
 0x200   : > { %v703_v54 = vld [vmem:[#allocation2 + $0xe0] sm:$0xff]  ;;  %v731_v3 = vadd.f32 %v712_v50, %v687_v44  ;;  %v688_v7 = vld [vmem:[#allocation2 + $0x68] sm:$0xff]  ;;  %1020 = vst [vmem:[%s2008_s22 + $0x88] sm:$0xff] %v722_v23  ;;  %1021 = vst [vmem:[%s2008_s22 + $0x90] sm:$0xff] %v724_v24 }
 0x201   : > { %v747_v17 = vadd.f32 %v712_v50, %v703_v54  ;;  %v704_v27 = vld [vmem:[#allocation2 + $0xe8] sm:$0xff]  ;;  %v732_v31 = vadd.f32 %v2078_v57, %v688_v7  ;;  %1022 = vst [vmem:[%s2008_s22 + $0x98] sm:$0xff] %v726_v25  ;;  %1023 = vst [vmem:[%s2008_s22 + $0xa0] sm:$0xff] %v728_v29 }
 0x202   : > { %757 = vst [vmem:[%s2008_s22 + $0x30] sm:$0xff] %v731_v3  ;;  %1024 = vst [vmem:[%s2008_s22 + $0xa8] sm:$0xff] %v730_v30  ;;  %v748_v39 = vadd.f32 %v2078_v57, %v704_v27 }
 0x203   : > { %v689_v45 = vld [vmem:[#allocation2 + $0x70] sm:$0xff]  ;;  %765 = vst [vmem:[%s2008_s22 + $0x70] sm:$0xff] %v747_v17  ;;  %1025 = vst [vmem:[%s2008_s22 + $0xb0] sm:$0xff] %v732_v31 }
 0x204   : > { %v705_v55 = vld [vmem:[#allocation2 + $0xf0] sm:$0xff]  ;;  %v733_v4 = vadd.f32 %v712_v50, %v689_v45  ;;  %v690_v13 = vld [vmem:[#allocation2 + $0x78] sm:$0xff]  ;;  %1027 = vst [vmem:[%s2008_s22 + $0xc0] sm:$0xff] %v736_v33  ;;  %1028 = vst [vmem:[%s2008_s22 + $0xc8] sm:$0xff] %v738_v34 }
 0x205   : > { %v749_v18 = vadd.f32 %v712_v50, %v705_v55  ;;  %v706_v28 = vld [vmem:[#allocation2 + $0xf8] sm:$0xff]  ;;  %v734_v32 = vadd.f32 %v2078_v57, %v690_v13  ;;  %1029 = vst [vmem:[%s2008_s22 + $0xd0] sm:$0xff] %v740_v35  ;;  %1030 = vst [vmem:[%s2008_s22 + $0xd8] sm:$0xff] %v742_v36 }
 0x206   : > { %758 = vst [vmem:[%s2008_s22 + $0x38] sm:$0xff] %v733_v4  ;;  %v750_v40 = vadd.f32 %v2078_v57, %v706_v28  ;;  %1031 = vst [vmem:[%s2008_s22 + $0xe0] sm:$0xff] %v744_v37 }
 0x207   : > { %766 = vst [vmem:[%s2008_s22 + $0x78] sm:$0xff] %v749_v18  ;;  %1026 = vst [vmem:[%s2008_s22 + $0xb8] sm:$0xff] %v734_v32 }
 0x208   : > { %1032 = vst [vmem:[%s2008_s22 + $0xe8] sm:$0xff] %v746_v38  ;;  %1033 = vst [vmem:[%s2008_s22 + $0xf0] sm:$0xff] %v748_v39 }
 0x209   : > { %1034 = vst [vmem:[%s2008_s22 + $0xf8] sm:$0xff] %v750_v40 }
 0x20a PF: > { %s785_s10 = scalar_lea.sflag [#allocation5], %s321_s25 }
 0x20b   : > { %s2333_s26 = sld [smem:[#allocation23_spill]]  ;;  %s2334_s30 = sld [smem:[#allocation24_spill]] }
 0x20c   : > { %s2335_s21 = sld [smem:[#allocation25_spill]]  ;;  %s2336_s18 = sld [smem:[#allocation33_spill]] }
 0x20d   : > { %s821_s1 = sshll.u32 %s2008_s22, 4  ;;  %s2337_s25 = sld [smem:[#allocation43_spill]]  ;;  %s822_s1 = int_to_ptr.vmem [resolvable:$true] %s821_s1 }
 0x20e   : > { %s1587_s11 = smov 2048   ;;  %s1588_s4 = smov 4096  }
 0x20f   : > { %s1589_s12 = smov 16   ;;  %s1591_s22 = smov 8  }
 0x211   : > { %s1036_s28 = sshll.u32 %s2333_s26, 4  ;;  %s1037_s29 = sshll.u32 %s2334_s30, 6 }
 0x212   : > { %s800_s7 = sadd.s32 %s1037_s29, %s1036_s28  ;;  %s1038_s13 = sshll.u32 %s2335_s21, 7 }
 0x213   : > { %s802_s15 = sadd.s32 %s1038_s13, %s800_s7  ;;  %p2338_p10 = scmp.ne.s32.totalorder %s2336_s18, 0 }
 0x214   : > { %s1039_s9 = sshll.u32 %s802_s15, 7  ;;  %s1590_s26 = smov 128  }
 0x215   : > { %s804_s8 = scalar_lea.hbm %s2337_s25, %s1039_s9  ;;  %1099 = sst [smem:[#allocation11]] (%p2338_p10), %s1587_s11 }
 0x216   : > { %1100 = sst [smem:[#allocation11 + $0x1]] (%p2338_p10), %s1588_s4  ;;  %s1592_s30 = smov [#allocation10]  }
 0x217   : > { %1101 = sst [smem:[#allocation11 + $0x2]] (%p2338_p10), %s1589_s12  ;;  %s1593_s21 = smov 0  }
 0x218   : > { %1102 = sst [smem:[#allocation11 + $0x3]] (%p2338_p10), %s1590_s26 }
 0x219   : > { %1103 = sst [smem:[#allocation11 + $0x4]] (%p2338_p10), %s1590_s26 }
 0x21a   : > { %1104 = sst [smem:[#allocation11 + $0x5]] (%p2338_p10), %s1591_s22 }
 0x21b   : > { %1105 = dma.general (%p2338_p10), %s822_s1, 4096, %s804_s8, %s785_s10, %s1592_s30, [#allocation11], %s1593_s21, 0  }
 0x21c PF: > { %s2339_s28 = sld [smem:[#allocation16_spill]]  ;;  %s2340_s29 = sld [smem:[#allocation34_spill]] }
 0x21d   : > { %p1122_p1 = scmp.ge.s32.totalorder %s1576_s5, 2 }
 0x222   : > { %s849_s7 = sand.u32 1, %s2339_s28   ;;  %p2341_p2 = scmp.ne.s32.totalorder %s2340_s29, 0 }
 0x223   : > { %s850_s13 = scalar_lea.sflag [#allocation5], %s849_s7 }
 0x224   : > { %p1118_p13 = pnand %p1122_p1, %p2341_p2 }
 0x226   : > { %1491 = dma.done.wait (!%p1118_p13), %s850_s13, 4096  }
 0x227   : > { %1493 = vsyncadd (!%p1118_p13), %s850_s13, 4294963200  ;;  %s22_s5 = sadd.s32 1, %s1576_s5   ;;  %s2344_s12 = sld [smem:[#allocation17_spill]] }
 0x228   : > { %p2156_p3 = scmp.ge.s32.totalorder %s22_s5, 26   ;;  %s2345_s15 = sld [smem:[#allocation19_spill]] }
 0x229   : > { %s2346_s10 = smov %s1935_s16  ;;  %s2347_s18 = sld [smem:[#allocation20_spill]] }
 0x22a   : > { %s2348_s21 = sld [smem:[#allocation21_spill]]  ;;  %s2349_s24 = sld [smem:[#allocation26_spill]] }
 0x22b   : > { %s2350_s25 = sld [smem:[#allocation27_spill]]  ;;  %s2351_s26 = sld [smem:[#allocation28_spill]] }
 0x22c   : > { %s2352_s1 = sld [smem:[#allocation29_spill]]  ;;  %s2353_s28 = sld [smem:[#allocation31_spill]] }
 0x22d   : > { %s2354_s13 = smov %s1504_s14  ;;  %s2355_s29 = sld [smem:[#allocation37_spill]] }
 0x22e   : > { %s2356_s14 = smov %s1882_s3  ;;  %s2357_s30 = sld [smem:[#allocation39_spill]] }
 0x22f   : > { %s2358_s4 = sld [smem:[#allocation40_spill]]  ;;  %s2359_s16 = smov %s1516_s17 }
 0x230   : > { %s2360_s17 = smov %s2346_s10  ;;  %s2361_s19 = smov %s1528_s20 }
 0x231   : > { %s2362_s20 = smov %s1879_s6  ;;  %s2363_s22 = smov %s1540_s23 }
 0x232   : > { %s2364_s23 = smov %s1871_s27  ;;  %s2365_s27 = smov %s2352_s1 }
 0x233   :  { %21 = sbr.rel (!%p2156_p3) target bundleno = 20 (0x14), region = 115 }
 0x23a   :  { %855 = vsyncpa [#allocation4], 1 }
 0x23b   :  { %857 = vsyncpa [#allocation4 + $0x1], 1 }
 0x23c   :  { %858 = vsyncpa [#allocation7], 1 }
 0x23d   :  { %860 = vsyncpa [#allocation7 + $0x1], 1 }
 0x23e   :  { %861 = vsyncpa [#allocation5], 1 }
 0x23f   :  { %863 = vsyncpa [#allocation5 + $0x1], 1 }

</bundles_post_ra>
